<compile_context>
chip_gen: v7x
topology: tpu7x:2x2x1
jax: 0.10.0
libtpu: 0.0.40
codegen_flags: <defaults>
</compile_context>

<pallas_src>
import functools

import jax
import jax.numpy as jnp
from jax.experimental import pallas as pl
from jax.experimental.pallas import tpu as pltpu


# ----------------------------- fused Pallas kernel -----------------------------

def _fused_mnist_kernel(x_ref, c1w_ref, c1b_ref, c2w_ref, c2b_ref,
                        f1w_ref, f1b_ref, f2w_ref, f2b_ref, out_ref):
    # x_ref:   (28, TB, 28) bf16   input tile, layout (h, n, w)
    # c1w_ref: (5, 28, 256) bf16   conv1 stride-2 Toeplitz; cols = s*128 + oc*12 + pw
    # c1b_ref: (1, 128) f32        conv1 bias per pooled column (pad lanes = 0)
    # c2w_ref: (5, 128, 256) bf16  conv2 Toeplitz; rows = ic*12 + pw, cols = s*128 + oc*4 + rw
    # c2b_ref: (1, 128) f32
    # f1w_ref: (512, 50) bf16      fc1; rows = rh*128 + oc*4 + rw (pad rows = 0)
    # f1b_ref: (1, 50) f32
    # f2w_ref: (50, 10) bf16       fc2, pre-transposed
    # f2b_ref: (1, 10) f32
    # out_ref: (TB, 10) f32        log_softmax output
    tb = x_ref.shape[1]
    f32 = jnp.float32
    bf16 = jnp.bfloat16

    # -------- conv1: 5x5, 1->10, 28x28 -> 24x24, fused ReLU + 2x2 max-pool --------
    # acc[oh*tb + n, s*128 + oc*12 + pw] = conv1(x)[n, oc, oh, 2*pw + s]
    acc = None
    for i in range(5):                                   # kernel rows (static unroll)
        lhs = x_ref[i:i + 24, :, :].reshape(24 * tb, 28)
        d = jnp.dot(lhs, c1w_ref[i], preferred_element_type=f32)
        acc = d if acc is None else acc + d
    r = jnp.maximum(acc[:, :128], acc[:, 128:])          # width-pair max (lane-aligned)
    r = jnp.maximum(r + c1b_ref[...], 0.0)               # one bias add + ReLU
    r = r.reshape(12, 2, tb, 128)                        # (ph, oh-parity, n, col)
    p1 = jnp.maximum(r[:, 0], r[:, 1]).astype(bf16)      # (12, tb, 128); col = ic*12 + pw

    # -------- conv2: 5x5, 10->20, 12x12 -> 8x8, fused ReLU + 2x2 max-pool --------
    acc = None
    for i in range(5):
        lhs = p1[i:i + 8].reshape(8 * tb, 128)
        d = jnp.dot(lhs, c2w_ref[i], preferred_element_type=f32)
        acc = d if acc is None else acc + d
    # TODO(synk): nn.Dropout2d is identity here (eval-mode forward).
    r = jnp.maximum(acc[:, :128], acc[:, 128:])
    r = jnp.maximum(r + c2b_ref[...], 0.0)               # (8*tb, 128)
    r = r.reshape(4, 2, tb, 128)
    p2 = jnp.maximum(r[:, 0], r[:, 1]).astype(bf16)      # (4, tb, 128); col = oc*4 + rw

    # -------- fc1 (320->50) + relu: one matmul over lane-concatenated pooled rows --------
    flat = jnp.concatenate([p2[0], p2[1], p2[2], p2[3]], axis=-1)   # (tb, 512) bf16
    h = jnp.dot(flat, f1w_ref[...], preferred_element_type=f32)     # (tb, 50)
    h = jnp.maximum(h + f1b_ref[...], 0.0).astype(bf16)
    # TODO(synk): F.dropout(training=self.training) is identity here (eval-mode forward).

    # -------- fc2 (50->10) + log_softmax (f32 epilogue) --------
    logits = jnp.dot(h, f2w_ref[...], preferred_element_type=f32) + f2b_ref[...]
    z = logits - jnp.max(logits, axis=1, keepdims=True)
    out_ref[...] = z - jnp.log(jnp.sum(jnp.exp(z), axis=1, keepdims=True))


# ----------------------------- weight packing (trace time) -----------------------------

def _prepare_weights(p):
    f32 = jnp.float32
    bf16 = jnp.bfloat16
    w1 = p["conv1_w"].astype(f32)   # (10, 1, 5, 5)
    b1 = p["conv1_b"].astype(f32)   # (10,)
    w2 = p["conv2_w"].astype(f32)   # (20, 10, 5, 5)
    b2 = p["conv2_b"].astype(f32)   # (20,)
    wf1 = p["fc1_w"].astype(f32)    # (50, 320)
    bf1 = p["fc1_b"].astype(f32)    # (50,)
    wf2 = p["fc2_w"].astype(f32)    # (10, 50)
    bf2 = p["fc2_b"].astype(f32)    # (10,)

    j = jnp.arange(5)

    # conv1 stride-2 Toeplitz: E1[j, s, w_in, pw] = 1 iff w_in == 2*pw + s + j
    w_in = jnp.arange(28)
    pw = jnp.arange(12)
    s = jnp.arange(2)
    E1 = (w_in[None, None, :, None] ==
          2 * pw[None, None, None, :] + s[None, :, None, None] + j[:, None, None, None]
          ).astype(f32)                                               # (5, 2, 28, 12)
    c1 = jnp.einsum("oij,jswp->iswop", w1[:, 0], E1)                  # (5, 2, 28, 10, 12)
    c1 = c1.reshape(5, 2, 28, 120)
    c1 = jnp.pad(c1, ((0, 0), (0, 0), (0, 0), (0, 8)))                # lane pad 120 -> 128
    c1w = jnp.concatenate([c1[:, 0], c1[:, 1]], axis=-1)              # (5, 28, 256)
    c1b = jnp.pad(jnp.repeat(b1, 12), (0, 8)).reshape(1, 128)

    # conv2 stride-2 Toeplitz: E2[j, s, pw, rw] = 1 iff pw == 2*rw + s + j
    p_in = jnp.arange(12)
    q = jnp.arange(4)
    E2 = (p_in[None, None, :, None] ==
          2 * q[None, None, None, :] + s[None, :, None, None] + j[:, None, None, None]
          ).astype(f32)                                               # (5, 2, 12, 4)
    c2 = jnp.einsum("ocij,jspq->iscpoq", w2, E2)                      # (5, 2, 10, 12, 20, 4)
    c2 = c2.reshape(5, 2, 120, 80)
    c2 = jnp.pad(c2, ((0, 0), (0, 0), (0, 8), (0, 48)))               # K 120->128, N 80->128
    c2w = jnp.concatenate([c2[:, 0], c2[:, 1]], axis=-1)              # (5, 128, 256)
    c2b = jnp.pad(jnp.repeat(b2, 4), (0, 48)).reshape(1, 128)

    # fc1: torch flatten order f = oc*16 + rh*4 + rw; kernel layout k-row = rh*128 + oc*4 + rw
    t1 = wf1.reshape(50, 20, 4, 4)                                    # (k, oc, rh, rw)
    t1 = jnp.transpose(t1, (2, 1, 3, 0))                              # (rh, oc, rw, k)
    t1 = t1.reshape(4, 80, 50)
    t1 = jnp.pad(t1, ((0, 0), (0, 48), (0, 0)))                       # (4, 128, 50)
    f1w = t1.reshape(512, 50)
    f1b = bf1.reshape(1, 50)

    f2w = wf2.T                                                       # (50, 10)
    f2b = bf2.reshape(1, 10)

    return (c1w.astype(bf16), c1b, c2w.astype(bf16), c2b,
            f1w.astype(bf16), f1b, f2w.astype(bf16), f2b)


# ----------------------------- wrapper -----------------------------

def _round_up(a, b):
    return (a + b - 1) // b * b


def _full_spec(shape):
    # Whole-array block; index_map ignores the batch grid axis -> loaded once,
    # stays resident in VMEM across all grid steps.
    # (pipeline_mode=pl.Buffered(1) could reclaim the second buffer on v7x if
    #  VMEM ever gets tight; not needed at these sizes.)
    return pl.BlockSpec(shape, lambda b: (0,) * len(shape))


@functools.partial(jax.jit, static_argnames=("block_batch",))
def simple_mnist_forward(x, params, *, block_batch=128):
    """x: (N, 1, 28, 28) float32 -> (N, 10) log-probs (matches torch forward)."""
    N = x.shape[0]
    assert x.shape[1:] == (1, 28, 28), x.shape

    # Batch tile: large enough to amortize per-step grid overhead, multiple of 16
    # (bf16 sublane packing), and <= ceil(N/2) when possible so grid >= 2 steps
    # (lets v7x spread batch tiles over both TensorCores).
    tb = _round_up(min(block_batch, max(16, -(-N // 2))), 16)
    n_pad = _round_up(N, tb)

    xs = x.reshape(N, 28, 28).astype(jnp.bfloat16)
    if n_pad != N:
        xs = jnp.pad(xs, ((0, n_pad - N), (0, 0), (0, 0)))
    # TODO(synk): this (n,h,w)->(h,n,w) transpose is a small fused XLA copy in HBM;
    # pre-storing inputs in (28, N, 28) layout would remove it entirely.
    x_hnw = jnp.transpose(xs, (1, 0, 2))                    # (28, N_pad, 28): (h, n, w)

    c1w, c1b, c2w, c2b, f1w, f1b, f2w, f2b = _prepare_weights(params)

    out = pl.pallas_call(
        _fused_mnist_kernel,
        out_shape=jax.ShapeDtypeStruct((n_pad, 10), jnp.float32),
        grid=(n_pad // tb,),
        in_specs=[
            pl.BlockSpec((28, tb, 28), lambda b: (0, b, 0)),   # input tile per batch block
            _full_spec((5, 28, 256)),    # conv1 Toeplitz (bf16, shift halves fused in lanes)
            _full_spec((1, 128)),        # conv1 bias
            _full_spec((5, 128, 256)),   # conv2 Toeplitz (bf16)
            _full_spec((1, 128)),        # conv2 bias
            _full_spec((512, 50)),       # fc1 (bf16, pooled rows concatenated along K)
            _full_spec((1, 50)),         # fc1 bias
            _full_spec((50, 10)),        # fc2 (bf16, pre-transposed)
            _full_spec((1, 10)),         # fc2 bias
        ],
        # Output is lane-sparse (10/128) but only ~40 B/img; left as-is per review.
        out_specs=pl.BlockSpec((tb, 10), lambda b: (b, 0)),
        compiler_params=pltpu.CompilerParams(
            dimension_semantics=("parallel",),        # v7x: shard batch tiles over both TCs
            vmem_limit_bytes=32 * 1024 * 1024,        # safe on v5e/v6e/v7x; ~8 MB used @ tb=128
        ),
    )(x_hnw, c1w, c1b, c2w, c2b, f1w, f1b, f2w, f2b)

    return out[:N]


# ----------------------------- pure-JAX reference (for self-check) -----------------------------

def _reference_forward(x, p):
    def conv(h, w, b):
        y = jax.lax.conv_general_dilated(
            h, w, (1, 1), "VALID", dimension_numbers=("NCHW", "OIHW", "NCHW"))
        return y + b.reshape(1, -1, 1, 1)

    def pool_relu(h):
        y = jax.lax.reduce_window(h, -jnp.inf, jax.lax.max,
                                  (1, 1, 2, 2), (1, 1, 2, 2), "VALID")
        return jnp.maximum(y, 0.0)

    h = pool_relu(conv(x, p["conv1_w"], p["conv1_b"]))
    h = pool_relu(conv(h, p["conv2_w"], p["conv2_b"]))
    h = h.reshape(x.shape[0], 320)
    h = jnp.maximum(h @ p["fc1_w"].T + p["fc1_b"], 0.0)
    logits = h @ p["fc2_w"].T + p["fc2_b"]
    return jax.nn.log_softmax(logits, axis=1)


# ----------------------------- parameter init -----------------------------

def _uniform(key, shape, bound):
    return jax.random.uniform(key, shape, jnp.float32, minval=-bound, maxval=bound)


def init_params(seed=0):
    """Deterministic PyTorch-style (U[-1/sqrt(fan_in), 1/sqrt(fan_in)]) init."""
    keys = jax.random.split(jax.random.PRNGKey(seed), 8)
    p = {}
    fan = 1 * 5 * 5
    p["conv1_w"] = _uniform(keys[0], (10, 1, 5, 5), 1.0 / jnp.sqrt(fan))
    p["conv1_b"] = _uniform(keys[1], (10,), 1.0 / jnp.sqrt(fan))
    fan = 10 * 5 * 5
    p["conv2_w"] = _uniform(keys[2], (20, 10, 5, 5), 1.0 / jnp.sqrt(fan))
    p["conv2_b"] = _uniform(keys[3], (20,), 1.0 / jnp.sqrt(fan))
    fan = 320
    p["fc1_w"] = _uniform(keys[4], (50, 320), 1.0 / jnp.sqrt(fan))
    p["fc1_b"] = _uniform(keys[5], (50,), 1.0 / jnp.sqrt(fan))
    fan = 50
    p["fc2_w"] = _uniform(keys[6], (10, 50), 1.0 / jnp.sqrt(fan))
    p["fc2_b"] = _uniform(keys[7], (10,), 1.0 / jnp.sqrt(fan))
    return p


if __name__ == "__main__":
    key = jax.random.PRNGKey(0)
    # MNIST-shaped input: batch=2, 1 channel, 28x28 (required for view(-1, 320))
    x = jax.random.normal(key, (2, 1, 28, 28), dtype=jnp.float32)
    params = init_params(seed=0)

    out = jax.block_until_ready(simple_mnist_forward(x, params))

    assert out.shape == (2, 10), out.shape
    # log_softmax rows must exp-sum to 1
    assert bool(jnp.allclose(jnp.sum(jnp.exp(out), axis=1), 1.0, atol=1e-4))
    # check against a pure-JAX reference (tolerance absorbs bf16 matmul operands)
    ref = _reference_forward(x, params)
    max_err = float(jnp.max(jnp.abs(out - ref)))
    assert bool(jnp.allclose(out, ref, atol=3e-2, rtol=3e-2)), max_err
    print("KERNEL_OK")
</pallas_src>

<mosaic_0001>
module attributes {stable_mosaic.version = 11 : i64} {
  func.func @_fused_mnist_kernel(%arg0: i32, %arg1: memref<28x16x28xbf16, #tpu.memory_space<vmem>>, %arg2: memref<5x28x256xbf16, #tpu.memory_space<vmem>>, %arg3: memref<1x128xf32, #tpu.memory_space<vmem>>, %arg4: memref<5x128x256xbf16, #tpu.memory_space<vmem>>, %arg5: memref<1x128xf32, #tpu.memory_space<vmem>>, %arg6: memref<512x50xbf16, #tpu.memory_space<vmem>>, %arg7: memref<1x50xf32, #tpu.memory_space<vmem>>, %arg8: memref<50x10xbf16, #tpu.memory_space<vmem>>, %arg9: memref<1x10xf32, #tpu.memory_space<vmem>>, %arg10: memref<16x10xf32, #tpu.memory_space<vmem>>) attributes {dimension_semantics = [#tpu.dimension_semantics<parallel>], iteration_bounds = array<i64: 1>, scalar_prefetch = 0 : i64, scratch_operands = 0 : i64, tpu.core_type = #tpu.core_type<tc>, window_params = [{transform_indices = @transform_0, window_bounds = array<i64: 28, 16, 28>}, {pipeline_mode = #tpu.pipeline_mode<synchronous>, transform_indices = @transform_1, window_bounds = array<i64: 5, 28, 256>}, {pipeline_mode = #tpu.pipeline_mode<synchronous>, transform_indices = @transform_2, window_bounds = array<i64: 1, 128>}, {pipeline_mode = #tpu.pipeline_mode<synchronous>, transform_indices = @transform_3, window_bounds = array<i64: 5, 128, 256>}, {pipeline_mode = #tpu.pipeline_mode<synchronous>, transform_indices = @transform_4, window_bounds = array<i64: 1, 128>}, {pipeline_mode = #tpu.pipeline_mode<synchronous>, transform_indices = @transform_5, window_bounds = array<i64: 512, 50>}, {pipeline_mode = #tpu.pipeline_mode<synchronous>, transform_indices = @transform_6, window_bounds = array<i64: 1, 50>}, {pipeline_mode = #tpu.pipeline_mode<synchronous>, transform_indices = @transform_7, window_bounds = array<i64: 50, 10>}, {pipeline_mode = #tpu.pipeline_mode<synchronous>, transform_indices = @transform_8, window_bounds = array<i64: 1, 10>}, {transform_indices = @transform_9, window_bounds = array<i64: 16, 10>}]} {
    %c0 = arith.constant 0 : index
    %c0_0 = arith.constant 0 : index
    %c0_1 = arith.constant 0 : index
    %0 = vector.load %arg1[%c0, %c0_0, %c0_1] : memref<28x16x28xbf16, #tpu.memory_space<vmem>>, vector<24x16x28xbf16>
    %1 = vector.shape_cast %0 : vector<24x16x28xbf16> to vector<384x28xbf16>
    %c0_2 = arith.constant 0 : index
    %c0_3 = arith.constant 0 : index
    %c0_4 = arith.constant 0 : index
    %2 = vector.load %arg2[%c0_2, %c0_3, %c0_4] : memref<5x28x256xbf16, #tpu.memory_space<vmem>>, vector<1x28x256xbf16>
    %3 = vector.shape_cast %2 : vector<1x28x256xbf16> to vector<28x256xbf16>
    %cst = arith.constant dense<0.000000e+00> : vector<384x256xf32>
    %4 = tpu.matmul %1, %3, %cst {dimension_numbers = #tpu.dot_dimension_numbers<[1], [0], [0], [1], [0, 0, 1, 1], [], []>} : vector<384x28xbf16>, vector<28x256xbf16>, vector<384x256xf32> -> vector<384x256xf32>
    %c1 = arith.constant 1 : index
    %c0_5 = arith.constant 0 : index
    %c0_6 = arith.constant 0 : index
    %5 = vector.load %arg1[%c1, %c0_5, %c0_6] : memref<28x16x28xbf16, #tpu.memory_space<vmem>>, vector<24x16x28xbf16>
    %6 = vector.shape_cast %5 : vector<24x16x28xbf16> to vector<384x28xbf16>
    %c1_7 = arith.constant 1 : index
    %c0_8 = arith.constant 0 : index
    %c0_9 = arith.constant 0 : index
    %7 = vector.load %arg2[%c1_7, %c0_8, %c0_9] : memref<5x28x256xbf16, #tpu.memory_space<vmem>>, vector<1x28x256xbf16>
    %8 = vector.shape_cast %7 : vector<1x28x256xbf16> to vector<28x256xbf16>
    %cst_10 = arith.constant dense<0.000000e+00> : vector<384x256xf32>
    %9 = tpu.matmul %6, %8, %cst_10 {dimension_numbers = #tpu.dot_dimension_numbers<[1], [0], [0], [1], [0, 0, 1, 1], [], []>} : vector<384x28xbf16>, vector<28x256xbf16>, vector<384x256xf32> -> vector<384x256xf32>
    %10 = arith.addf %4, %9 : vector<384x256xf32>
    %c2 = arith.constant 2 : index
    %c0_11 = arith.constant 0 : index
    %c0_12 = arith.constant 0 : index
    %11 = vector.load %arg1[%c2, %c0_11, %c0_12] : memref<28x16x28xbf16, #tpu.memory_space<vmem>>, vector<24x16x28xbf16>
    %12 = vector.shape_cast %11 : vector<24x16x28xbf16> to vector<384x28xbf16>
    %c2_13 = arith.constant 2 : index
    %c0_14 = arith.constant 0 : index
    %c0_15 = arith.constant 0 : index
    %13 = vector.load %arg2[%c2_13, %c0_14, %c0_15] : memref<5x28x256xbf16, #tpu.memory_space<vmem>>, vector<1x28x256xbf16>
    %14 = vector.shape_cast %13 : vector<1x28x256xbf16> to vector<28x256xbf16>
    %cst_16 = arith.constant dense<0.000000e+00> : vector<384x256xf32>
    %15 = tpu.matmul %12, %14, %cst_16 {dimension_numbers = #tpu.dot_dimension_numbers<[1], [0], [0], [1], [0, 0, 1, 1], [], []>} : vector<384x28xbf16>, vector<28x256xbf16>, vector<384x256xf32> -> vector<384x256xf32>
    %16 = arith.addf %10, %15 : vector<384x256xf32>
    %c3 = arith.constant 3 : index
    %c0_17 = arith.constant 0 : index
    %c0_18 = arith.constant 0 : index
    %17 = vector.load %arg1[%c3, %c0_17, %c0_18] : memref<28x16x28xbf16, #tpu.memory_space<vmem>>, vector<24x16x28xbf16>
    %18 = vector.shape_cast %17 : vector<24x16x28xbf16> to vector<384x28xbf16>
    %c3_19 = arith.constant 3 : index
    %c0_20 = arith.constant 0 : index
    %c0_21 = arith.constant 0 : index
    %19 = vector.load %arg2[%c3_19, %c0_20, %c0_21] : memref<5x28x256xbf16, #tpu.memory_space<vmem>>, vector<1x28x256xbf16>
    %20 = vector.shape_cast %19 : vector<1x28x256xbf16> to vector<28x256xbf16>
    %cst_22 = arith.constant dense<0.000000e+00> : vector<384x256xf32>
    %21 = tpu.matmul %18, %20, %cst_22 {dimension_numbers = #tpu.dot_dimension_numbers<[1], [0], [0], [1], [0, 0, 1, 1], [], []>} : vector<384x28xbf16>, vector<28x256xbf16>, vector<384x256xf32> -> vector<384x256xf32>
    %22 = arith.addf %16, %21 : vector<384x256xf32>
    %c4 = arith.constant 4 : index
    %c0_23 = arith.constant 0 : index
    %c0_24 = arith.constant 0 : index
    %23 = vector.load %arg1[%c4, %c0_23, %c0_24] : memref<28x16x28xbf16, #tpu.memory_space<vmem>>, vector<24x16x28xbf16>
    %24 = vector.shape_cast %23 : vector<24x16x28xbf16> to vector<384x28xbf16>
    %c4_25 = arith.constant 4 : index
    %c0_26 = arith.constant 0 : index
    %c0_27 = arith.constant 0 : index
    %25 = vector.load %arg2[%c4_25, %c0_26, %c0_27] : memref<5x28x256xbf16, #tpu.memory_space<vmem>>, vector<1x28x256xbf16>
    %26 = vector.shape_cast %25 : vector<1x28x256xbf16> to vector<28x256xbf16>
    %cst_28 = arith.constant dense<0.000000e+00> : vector<384x256xf32>
    %27 = tpu.matmul %24, %26, %cst_28 {dimension_numbers = #tpu.dot_dimension_numbers<[1], [0], [0], [1], [0, 0, 1, 1], [], []>} : vector<384x28xbf16>, vector<28x256xbf16>, vector<384x256xf32> -> vector<384x256xf32>
    %28 = arith.addf %22, %27 : vector<384x256xf32>
    %29 = vector.extract_strided_slice %28 {offsets = [0, 0], sizes = [384, 128], strides = [1, 1]} : vector<384x256xf32> to vector<384x128xf32>
    %30 = vector.extract_strided_slice %28 {offsets = [0, 128], sizes = [384, 128], strides = [1, 1]} : vector<384x256xf32> to vector<384x128xf32>
    %31 = arith.maximumf %29, %30 : vector<384x128xf32>
    %c0_29 = arith.constant 0 : index
    %c0_30 = arith.constant 0 : index
    %32 = vector.load %arg3[%c0_29, %c0_30] : memref<1x128xf32, #tpu.memory_space<vmem>>, vector<1x128xf32>
    %33 = vector.broadcast %32 : vector<1x128xf32> to vector<384x128xf32>
    %34 = arith.addf %31, %33 : vector<384x128xf32>
    %cst_31 = arith.constant 0.000000e+00 : f32
    %35 = vector.broadcast %cst_31 : f32 to vector<384x128xf32>
    %36 = arith.maximumf %34, %35 : vector<384x128xf32>
    %37 = vector.shape_cast %36 : vector<384x128xf32> to vector<12x2x16x128xf32>
    %38 = vector.extract_strided_slice %37 {offsets = [0, 0, 0, 0], sizes = [12, 1, 16, 128], strides = [1, 1, 1, 1]} : vector<12x2x16x128xf32> to vector<12x1x16x128xf32>
    %39 = vector.shape_cast %38 : vector<12x1x16x128xf32> to vector<12x16x128xf32>
    %40 = vector.extract_strided_slice %37 {offsets = [0, 1, 0, 0], sizes = [12, 1, 16, 128], strides = [1, 1, 1, 1]} : vector<12x2x16x128xf32> to vector<12x1x16x128xf32>
    %41 = vector.shape_cast %40 : vector<12x1x16x128xf32> to vector<12x16x128xf32>
    %42 = arith.maximumf %39, %41 : vector<12x16x128xf32>
    %43 = arith.truncf %42 : vector<12x16x128xf32> to vector<12x16x128xbf16>
    %44 = vector.extract_strided_slice %43 {offsets = [0, 0, 0], sizes = [8, 16, 128], strides = [1, 1, 1]} : vector<12x16x128xbf16> to vector<8x16x128xbf16>
    %45 = vector.shape_cast %44 : vector<8x16x128xbf16> to vector<128x128xbf16>
    %c0_32 = arith.constant 0 : index
    %c0_33 = arith.constant 0 : index
    %c0_34 = arith.constant 0 : index
    %46 = vector.load %arg4[%c0_32, %c0_33, %c0_34] : memref<5x128x256xbf16, #tpu.memory_space<vmem>>, vector<1x128x256xbf16>
    %47 = vector.shape_cast %46 : vector<1x128x256xbf16> to vector<128x256xbf16>
    %cst_35 = arith.constant dense<0.000000e+00> : vector<128x256xf32>
    %48 = tpu.matmul %45, %47, %cst_35 {dimension_numbers = #tpu.dot_dimension_numbers<[1], [0], [0], [1], [0, 0, 1, 1], [], []>} : vector<128x128xbf16>, vector<128x256xbf16>, vector<128x256xf32> -> vector<128x256xf32>
    %49 = vector.extract_strided_slice %43 {offsets = [1, 0, 0], sizes = [8, 16, 128], strides = [1, 1, 1]} : vector<12x16x128xbf16> to vector<8x16x128xbf16>
    %50 = vector.shape_cast %49 : vector<8x16x128xbf16> to vector<128x128xbf16>
    %c1_36 = arith.constant 1 : index
    %c0_37 = arith.constant 0 : index
    %c0_38 = arith.constant 0 : index
    %51 = vector.load %arg4[%c1_36, %c0_37, %c0_38] : memref<5x128x256xbf16, #tpu.memory_space<vmem>>, vector<1x128x256xbf16>
    %52 = vector.shape_cast %51 : vector<1x128x256xbf16> to vector<128x256xbf16>
    %cst_39 = arith.constant dense<0.000000e+00> : vector<128x256xf32>
    %53 = tpu.matmul %50, %52, %cst_39 {dimension_numbers = #tpu.dot_dimension_numbers<[1], [0], [0], [1], [0, 0, 1, 1], [], []>} : vector<128x128xbf16>, vector<128x256xbf16>, vector<128x256xf32> -> vector<128x256xf32>
    %54 = arith.addf %48, %53 : vector<128x256xf32>
    %55 = vector.extract_strided_slice %43 {offsets = [2, 0, 0], sizes = [8, 16, 128], strides = [1, 1, 1]} : vector<12x16x128xbf16> to vector<8x16x128xbf16>
    %56 = vector.shape_cast %55 : vector<8x16x128xbf16> to vector<128x128xbf16>
    %c2_40 = arith.constant 2 : index
    %c0_41 = arith.constant 0 : index
    %c0_42 = arith.constant 0 : index
    %57 = vector.load %arg4[%c2_40, %c0_41, %c0_42] : memref<5x128x256xbf16, #tpu.memory_space<vmem>>, vector<1x128x256xbf16>
    %58 = vector.shape_cast %57 : vector<1x128x256xbf16> to vector<128x256xbf16>
    %cst_43 = arith.constant dense<0.000000e+00> : vector<128x256xf32>
    %59 = tpu.matmul %56, %58, %cst_43 {dimension_numbers = #tpu.dot_dimension_numbers<[1], [0], [0], [1], [0, 0, 1, 1], [], []>} : vector<128x128xbf16>, vector<128x256xbf16>, vector<128x256xf32> -> vector<128x256xf32>
    %60 = arith.addf %54, %59 : vector<128x256xf32>
    %61 = vector.extract_strided_slice %43 {offsets = [3, 0, 0], sizes = [8, 16, 128], strides = [1, 1, 1]} : vector<12x16x128xbf16> to vector<8x16x128xbf16>
    %62 = vector.shape_cast %61 : vector<8x16x128xbf16> to vector<128x128xbf16>
    %c3_44 = arith.constant 3 : index
    %c0_45 = arith.constant 0 : index
    %c0_46 = arith.constant 0 : index
    %63 = vector.load %arg4[%c3_44, %c0_45, %c0_46] : memref<5x128x256xbf16, #tpu.memory_space<vmem>>, vector<1x128x256xbf16>
    %64 = vector.shape_cast %63 : vector<1x128x256xbf16> to vector<128x256xbf16>
    %cst_47 = arith.constant dense<0.000000e+00> : vector<128x256xf32>
    %65 = tpu.matmul %62, %64, %cst_47 {dimension_numbers = #tpu.dot_dimension_numbers<[1], [0], [0], [1], [0, 0, 1, 1], [], []>} : vector<128x128xbf16>, vector<128x256xbf16>, vector<128x256xf32> -> vector<128x256xf32>
    %66 = arith.addf %60, %65 : vector<128x256xf32>
    %67 = vector.extract_strided_slice %43 {offsets = [4, 0, 0], sizes = [8, 16, 128], strides = [1, 1, 1]} : vector<12x16x128xbf16> to vector<8x16x128xbf16>
    %68 = vector.shape_cast %67 : vector<8x16x128xbf16> to vector<128x128xbf16>
    %c4_48 = arith.constant 4 : index
    %c0_49 = arith.constant 0 : index
    %c0_50 = arith.constant 0 : index
    %69 = vector.load %arg4[%c4_48, %c0_49, %c0_50] : memref<5x128x256xbf16, #tpu.memory_space<vmem>>, vector<1x128x256xbf16>
    %70 = vector.shape_cast %69 : vector<1x128x256xbf16> to vector<128x256xbf16>
    %cst_51 = arith.constant dense<0.000000e+00> : vector<128x256xf32>
    %71 = tpu.matmul %68, %70, %cst_51 {dimension_numbers = #tpu.dot_dimension_numbers<[1], [0], [0], [1], [0, 0, 1, 1], [], []>} : vector<128x128xbf16>, vector<128x256xbf16>, vector<128x256xf32> -> vector<128x256xf32>
    %72 = arith.addf %66, %71 : vector<128x256xf32>
    %73 = vector.extract_strided_slice %72 {offsets = [0, 0], sizes = [128, 128], strides = [1, 1]} : vector<128x256xf32> to vector<128x128xf32>
    %74 = vector.extract_strided_slice %72 {offsets = [0, 128], sizes = [128, 128], strides = [1, 1]} : vector<128x256xf32> to vector<128x128xf32>
    %75 = arith.maximumf %73, %74 : vector<128x128xf32>
    %c0_52 = arith.constant 0 : index
    %c0_53 = arith.constant 0 : index
    %76 = vector.load %arg5[%c0_52, %c0_53] : memref<1x128xf32, #tpu.memory_space<vmem>>, vector<1x128xf32>
    %77 = vector.broadcast %76 : vector<1x128xf32> to vector<128x128xf32>
    %78 = arith.addf %75, %77 : vector<128x128xf32>
    %cst_54 = arith.constant 0.000000e+00 : f32
    %79 = vector.broadcast %cst_54 : f32 to vector<128x128xf32>
    %80 = arith.maximumf %78, %79 : vector<128x128xf32>
    %81 = vector.shape_cast %80 : vector<128x128xf32> to vector<4x2x16x128xf32>
    %82 = vector.extract_strided_slice %81 {offsets = [0, 0, 0, 0], sizes = [4, 1, 16, 128], strides = [1, 1, 1, 1]} : vector<4x2x16x128xf32> to vector<4x1x16x128xf32>
    %83 = vector.shape_cast %82 : vector<4x1x16x128xf32> to vector<4x16x128xf32>
    %84 = vector.extract_strided_slice %81 {offsets = [0, 1, 0, 0], sizes = [4, 1, 16, 128], strides = [1, 1, 1, 1]} : vector<4x2x16x128xf32> to vector<4x1x16x128xf32>
    %85 = vector.shape_cast %84 : vector<4x1x16x128xf32> to vector<4x16x128xf32>
    %86 = arith.maximumf %83, %85 : vector<4x16x128xf32>
    %87 = arith.truncf %86 : vector<4x16x128xf32> to vector<4x16x128xbf16>
    %88 = vector.extract_strided_slice %87 {offsets = [0, 0, 0], sizes = [1, 16, 128], strides = [1, 1, 1]} : vector<4x16x128xbf16> to vector<1x16x128xbf16>
    %89 = vector.shape_cast %88 : vector<1x16x128xbf16> to vector<16x128xbf16>
    %90 = vector.extract_strided_slice %87 {offsets = [1, 0, 0], sizes = [1, 16, 128], strides = [1, 1, 1]} : vector<4x16x128xbf16> to vector<1x16x128xbf16>
    %91 = vector.shape_cast %90 : vector<1x16x128xbf16> to vector<16x128xbf16>
    %92 = vector.extract_strided_slice %87 {offsets = [2, 0, 0], sizes = [1, 16, 128], strides = [1, 1, 1]} : vector<4x16x128xbf16> to vector<1x16x128xbf16>
    %93 = vector.shape_cast %92 : vector<1x16x128xbf16> to vector<16x128xbf16>
    %94 = vector.extract_strided_slice %87 {offsets = [3, 0, 0], sizes = [1, 16, 128], strides = [1, 1, 1]} : vector<4x16x128xbf16> to vector<1x16x128xbf16>
    %95 = vector.shape_cast %94 : vector<1x16x128xbf16> to vector<16x128xbf16>
    %96 = tpu.concatenate %89, %91, %93, %95 in 1 : vector<16x128xbf16>, vector<16x128xbf16>, vector<16x128xbf16>, vector<16x128xbf16> -> vector<16x512xbf16>
    %c0_55 = arith.constant 0 : index
    %c0_56 = arith.constant 0 : index
    %97 = vector.load %arg6[%c0_55, %c0_56] : memref<512x50xbf16, #tpu.memory_space<vmem>>, vector<512x50xbf16>
    %cst_57 = arith.constant dense<0.000000e+00> : vector<16x50xf32>
    %98 = tpu.matmul %96, %97, %cst_57 {dimension_numbers = #tpu.dot_dimension_numbers<[1], [0], [0], [1], [0, 0, 1, 1], [], []>} : vector<16x512xbf16>, vector<512x50xbf16>, vector<16x50xf32> -> vector<16x50xf32>
    %c0_58 = arith.constant 0 : index
    %c0_59 = arith.constant 0 : index
    %99 = vector.load %arg7[%c0_58, %c0_59] : memref<1x50xf32, #tpu.memory_space<vmem>>, vector<1x50xf32>
    %100 = vector.broadcast %99 : vector<1x50xf32> to vector<16x50xf32>
    %101 = arith.addf %98, %100 : vector<16x50xf32>
    %cst_60 = arith.constant 0.000000e+00 : f32
    %102 = vector.broadcast %cst_60 : f32 to vector<16x50xf32>
    %103 = arith.maximumf %101, %102 : vector<16x50xf32>
    %104 = arith.truncf %103 : vector<16x50xf32> to vector<16x50xbf16>
    %c0_61 = arith.constant 0 : index
    %c0_62 = arith.constant 0 : index
    %105 = vector.load %arg8[%c0_61, %c0_62] : memref<50x10xbf16, #tpu.memory_space<vmem>>, vector<50x10xbf16>
    %cst_63 = arith.constant dense<0.000000e+00> : vector<16x10xf32>
    %106 = tpu.matmul %104, %105, %cst_63 {dimension_numbers = #tpu.dot_dimension_numbers<[1], [0], [0], [1], [0, 0, 1, 1], [], []>} : vector<16x50xbf16>, vector<50x10xbf16>, vector<16x10xf32> -> vector<16x10xf32>
    %c0_64 = arith.constant 0 : index
    %c0_65 = arith.constant 0 : index
    %107 = vector.load %arg9[%c0_64, %c0_65] : memref<1x10xf32, #tpu.memory_space<vmem>>, vector<1x10xf32>
    %108 = vector.broadcast %107 : vector<1x10xf32> to vector<16x10xf32>
    %109 = arith.addf %106, %108 : vector<16x10xf32>
    %cst_66 = arith.constant dense<0xFF800000> : vector<16xf32>
    %110 = vector.multi_reduction <maximumf>, %109, %cst_66 [1] : vector<16x10xf32> to vector<16xf32>
    %111 = vector.shape_cast %110 : vector<16xf32> to vector<16x1xf32>
    %112 = vector.broadcast %111 : vector<16x1xf32> to vector<16x10xf32>
    %113 = arith.subf %109, %112 : vector<16x10xf32>
    %114 = math.exp %113 : vector<16x10xf32>
    %cst_67 = arith.constant dense<0.000000e+00> : vector<16xf32>
    %115 = vector.multi_reduction <add>, %114, %cst_67 [1] : vector<16x10xf32> to vector<16xf32>
    %116 = vector.shape_cast %115 : vector<16xf32> to vector<16x1xf32>
    %117 = math.log %116 : vector<16x1xf32>
    %118 = vector.broadcast %117 : vector<16x1xf32> to vector<16x10xf32>
    %119 = arith.subf %113, %118 : vector<16x10xf32>
    %c0_68 = arith.constant 0 : index
    %c0_69 = arith.constant 0 : index
    %120 = vector.load %arg10[%c0_68, %c0_69] : memref<16x10xf32, #tpu.memory_space<vmem>>, vector<16x10xf32>
    tpu.vector_store %arg10[%c0_68, %c0_69], %119 {strides = array<i32>} : memref<16x10xf32, #tpu.memory_space<vmem>>, vector<16x10xf32>,
    return
  }
  func.func @transform_0(%arg0: i32) -> (i32, i32, i32) {
    %c0_i32 = arith.constant 0 : i32
    %c0_i32_0 = arith.constant 0 : i32
    %c0_i32_1 = arith.constant 0 : i32
    return %c0_i32, %arg0, %c0_i32_0 : i32, i32, i32
  }
  func.func @transform_1(%arg0: i32) -> (i32, i32, i32) {
    %c0_i32 = arith.constant 0 : i32
    %c0_i32_0 = arith.constant 0 : i32
    %c0_i32_1 = arith.constant 0 : i32
    %c0_i32_2 = arith.constant 0 : i32
    return %c0_i32, %c0_i32_0, %c0_i32_1 : i32, i32, i32
  }
  func.func @transform_2(%arg0: i32) -> (i32, i32) {
    %c0_i32 = arith.constant 0 : i32
    %c0_i32_0 = arith.constant 0 : i32
    %c0_i32_1 = arith.constant 0 : i32
    return %c0_i32, %c0_i32_0 : i32, i32
  }
  func.func @transform_3(%arg0: i32) -> (i32, i32, i32) {
    %c0_i32 = arith.constant 0 : i32
    %c0_i32_0 = arith.constant 0 : i32
    %c0_i32_1 = arith.constant 0 : i32
    %c0_i32_2 = arith.constant 0 : i32
    return %c0_i32, %c0_i32_0, %c0_i32_1 : i32, i32, i32
  }
  func.func @transform_4(%arg0: i32) -> (i32, i32) {
    %c0_i32 = arith.constant 0 : i32
    %c0_i32_0 = arith.constant 0 : i32
    %c0_i32_1 = arith.constant 0 : i32
    return %c0_i32, %c0_i32_0 : i32, i32
  }
  func.func @transform_5(%arg0: i32) -> (i32, i32) {
    %c0_i32 = arith.constant 0 : i32
    %c0_i32_0 = arith.constant 0 : i32
    %c0_i32_1 = arith.constant 0 : i32
    return %c0_i32, %c0_i32_0 : i32, i32
  }
  func.func @transform_6(%arg0: i32) -> (i32, i32) {
    %c0_i32 = arith.constant 0 : i32
    %c0_i32_0 = arith.constant 0 : i32
    %c0_i32_1 = arith.constant 0 : i32
    return %c0_i32, %c0_i32_0 : i32, i32
  }
  func.func @transform_7(%arg0: i32) -> (i32, i32) {
    %c0_i32 = arith.constant 0 : i32
    %c0_i32_0 = arith.constant 0 : i32
    %c0_i32_1 = arith.constant 0 : i32
    return %c0_i32, %c0_i32_0 : i32, i32
  }
  func.func @transform_8(%arg0: i32) -> (i32, i32) {
    %c0_i32 = arith.constant 0 : i32
    %c0_i32_0 = arith.constant 0 : i32
    %c0_i32_1 = arith.constant 0 : i32
    return %c0_i32, %c0_i32_0 : i32, i32
  }
  func.func @transform_9(%arg0: i32) -> (i32, i32) {
    %c0_i32 = arith.constant 0 : i32
    %c0_i32_0 = arith.constant 0 : i32
    return %arg0, %c0_i32 : i32, i32
  }
}

</mosaic_0001>

<bundles_post_ra>
// kernel: simple_mnist_forward.1
= control target key start
LH: loop header
LB: loop body
LE: loop exit
PB: predicated region body
PF: predicated region fallthrough
CT: control target
= control target key end

     0   :  { %v8044_v1 = vmov 0   ;;  %vm350_vm0 = vcmask 1045504   ;;  %vm277_vm1 = vcmask 228352   ;;  %vm4822_vm2 = vcmask 1040384   ;;  %s8034_s1 = inlined_call_operand.vmem [shape: bf16[5,28,256], index: 1, kind: input, shape index: {}]   ;;  %s8035_s0 = inlined_call_operand.vmem [shape: bf16[28,16,28], index: 0, kind: input, shape index: {}]   ;;  %s8036_s3 = inlined_call_operand.vmem [shape: bf16[5,128,256], index: 3, kind: input, shape index: {}]   ;;  %s8037_s2 = inlined_call_operand.vmem [shape: f32[1,128], index: 2, kind: input, shape index: {}]   ;;  %s8038_s5 = inlined_call_operand.vmem [shape: bf16[512,50], index: 5, kind: input, shape index: {}]   ;;  %s8039_s4 = inlined_call_operand.vmem [shape: f32[1,128], index: 4, kind: input, shape index: {}]   ;;  %s8040_s7 = inlined_call_operand.vmem [shape: bf16[50,10], index: 7, kind: input, shape index: {}]   ;;  %s8041_s6 = inlined_call_operand.vmem [shape: f32[1,50], index: 6, kind: input, shape index: {}]   ;;  %s8042_s8 = inlined_call_operand.vmem [shape: f32[1,10], index: 8, kind: input, shape index: {}]   ;;  %s8043_s9 = inlined_call_operand.vmem [shape: f32[16,10], index: 9, kind: output, shape index: {}]  }
   0x1   :  { %v6506_v0 = vld [vmem:[%s8034_s1 + $0x4] ss:$8 sps:$4 sm:$0xff]   ;;  %878 = vmatprep.mubr.bf16.mxu0 %v8044_v1  ;;  %389 = vmatprep.mubr.bf16.mxu1 %v8044_v1  ;;  %v6513_v2 = vld [vmem:[%s8034_s1] ss:$8 sps:$4 sm:$0xff]   ;;  %v6147_v14 = vld [vmem:[%s8035_s0 + $0x10] sm:$0xff]   ;;  %vm6452_vm3 = vmmov 0  }
   0x2   :  { %846 = vmatprep.subr.bf16.mxu0 %v6506_v0  ;;  %v6519_v3 = vld [vmem:[%s8034_s1 + $0x14] ss:$8 sps:$4 sm:$0x3f]   ;;  %v6141_v4 = vld [vmem:[%s8034_s1 + $0x10] ss:$8 sps:$4 sm:$0x3f]  }
   0x3   :  { %847 = vmatpush1.bf16.msra.mxu0 %v6513_v2  ;;  %v6528_v5 = vsel %vm350_vm0, %v6141_v4, 0  ;;  %v6145_v6 = vld [vmem:[%s8034_s1 + $0x44] ss:$8 sps:$4 sm:$0xff]   ;;  %v6143_v8 = vld [vmem:[%s8034_s1 + $0x40] ss:$8 sps:$4 sm:$0xff]   ;;  %v6148_v15 = vld [vmem:[%s8035_s0 + $0x18] sm:$0xff]  }
   0x4   :  { %5031 = vmatprep.subr.msk.bf16.mxu0 %vm350_vm0, %v6519_v3  ;;  %v6142_v7 = vld [vmem:[%s8035_s0] sm:$0xff]   ;;  %v6152_v9 = vld [vmem:[%s8034_s1 + $0x54] ss:$8 sps:$4 sm:$0x3f]   ;;  %v6146_v11 = vld [vmem:[%s8035_s0 + $0x8] sm:$0xff]   ;;  %vm4818_vm4 = vcmask 408576  }
   0x5   :  { %v6154_v10 = vld [vmem:[%s8034_s1 + $0x50] ss:$8 sps:$4 sm:$0x3f]   ;;  %v6163_v13 = vld [vmem:[%s8034_s1 + $0x64] ss:$8 sps:$4 sm:$0xff]   ;;  %vm4867_vm5 = vcmask 80896  }
   0x6   :  { %v1384_v12 = vsel %vm350_vm0, %v6154_v10, 0  ;;  %v6149_v16 = vld [vmem:[%s8035_s0 + $0x20] sm:$0xff]   ;;  %v6150_v17 = vld [vmem:[%s8035_s0 + $0x28] sm:$0xff]   ;;  %v6151_v18 = vld [vmem:[%s8035_s0 + $0x30] sm:$0xff]  }
   0x7   :  { %849 = vmatpush1.bf16.msra.mxu0 %v6528_v5  ;;  %v6155_v19 = vld [vmem:[%s8035_s0 + $0x38] sm:$0xff]   ;;  %v6156_v20 = vld [vmem:[%s8035_s0 + $0x40] sm:$0xff]   ;;  %v6157_v21 = vld [vmem:[%s8035_s0 + $0x48] sm:$0xff]  }
   0x8   :  { %1389 = vmatprep.subr.bf16.mxu0 %v6145_v6  ;;  %v6158_v22 = vld [vmem:[%s8035_s0 + $0x50] sm:$0xff]   ;;  %v6159_v23 = vld [vmem:[%s8035_s0 + $0x58] sm:$0xff]   ;;  %v6161_v25 = vld [vmem:[%s8034_s1 + $0x60] ss:$8 sps:$4 sm:$0xff]  }
   0x9   :  { %v6160_v24 = vld [vmem:[%s8035_s0 + $0x10] sm:$0xff]   ;;  %v6164_v29 = vld [vmem:[%s8035_s0 + $0x18] sm:$0xff]   ;;  %v6165_v30 = vld [vmem:[%s8035_s0 + $0x20] sm:$0xff]  }
   0xa   :  { %5032 = vmatmul.mubr.msk.bf16.vlgmr.msra.gmra.mrb[0].mxu0 %vm277_vm1, %v6142_v7  ;;  %v6176_v26 = vld [vmem:[%s8034_s1 + $0x74] ss:$8 sps:$4 sm:$0x3f]   ;;  %v6178_v27 = vld [vmem:[%s8034_s1 + $0x70] ss:$8 sps:$4 sm:$0x3f]  }
   0xb   :  { %1390 = vmatpush1.bf16.msra.mxu0 %v6143_v8  ;;  %888 = vmatprep.mubr.bf16.mxu0 %v8044_v1  ;;  %v2023_v28 = vsel %vm350_vm0, %v6178_v27, 0  ;;  %v6166_v31 = vld [vmem:[%s8035_s0 + $0x28] sm:$0xff]   ;;  %v6167_v32 = vld [vmem:[%s8035_s0 + $0x30] sm:$0xff]   ;;  %v6168_v33 = vld [vmem:[%s8035_s0 + $0x38] sm:$0xff]  }
   0xc   :  { %5136 = vmatprep.subr.msk.bf16.mxu0 %vm350_vm0, %v6152_v9  ;;  %v6169_v34 = vld [vmem:[%s8035_s0 + $0x40] sm:$0xff]   ;;  %v6170_v37 = vld [vmem:[%s8035_s0 + $0x48] sm:$0xff]   ;;  %v6193_v38 = vld [vmem:[%s8034_s1 + $0x34] ss:$8 sps:$4 sm:$0x3f]  }
   0xd   :  { %v6189_v35 = vld [vmem:[%s8034_s1 + $0x24] ss:$8 sps:$4 sm:$0xff]   ;;  %v6191_v36 = vld [vmem:[%s8034_s1 + $0x20] ss:$8 sps:$4 sm:$0xff]   ;;  %v6171_v42 = vld [vmem:[%s8035_s0 + $0x50] sm:$0xff]  }
   0xe   :  { %357 = vmatprep.subr.bf16.mxu1 %v6189_v35  ;;  %v6195_v39 = vld [vmem:[%s8034_s1 + $0x30] ss:$8 sps:$4 sm:$0x3f]   ;;  %v6196_v41 = vld [vmem:[%s8035_s0 + $0x8] sm:$0xff]   ;;  %v6173_v47 = vld [vmem:[%s8035_s0 + $0x60] sm:$0xff]  }
   0xf   :  { %1392 = vmatpush1.bf16.msra.mxu0 %v1384_v12  ;;  %358 = vmatpush1.bf16.msra.mxu1 %v6191_v36  ;;  %v352_v40 = vsel %vm350_vm0, %v6195_v39, 0  ;;  %v6200_v43 = vld [vmem:[%s8034_s1 + $0x84] ss:$8 sps:$4 sm:$0xff]   ;;  %v6201_v44 = vld [vmem:[%s8035_s0 + $0x10] sm:$0xff]   ;;  %v6172_v45 = vld [vmem:[%s8035_s0 + $0x58] sm:$0xff]  }
  0x10   :  { %2028 = vmatprep.subr.bf16.mxu0 %v6163_v13  ;;  %4978 = vmatprep.subr.msk.bf16.mxu1 %vm350_vm0, %v6193_v38  ;;  %v6203_v46 = vld [vmem:[%s8035_s0 + $0x18] sm:$0xff]   ;;  %v6205_v48 = vld [vmem:[%s8035_s0 + $0x20] sm:$0xff]   ;;  %v6174_v49 = vld [vmem:[%s8035_s0 + $0x68] sm:$0xff]  }
  0x11   :  { %v6207_v50 = vld [vmem:[%s8035_s0 + $0x28] sm:$0xff]   ;;  %v6175_v51 = vld [vmem:[%s8035_s0 + $0x70] sm:$0xff]   ;;  %v6179_v53 = vld [vmem:[%s8035_s0 + $0x78] sm:$0xff]  }
  0x12   :  { %5033 = vmatmul.mubr.msk.bf16.gmra.mrb[4].mxu0 %vm277_vm1, %v6146_v11  ;;  %v6209_v52 = vld [vmem:[%s8035_s0 + $0x30] sm:$0xff]   ;;  %v6211_v54 = vld [vmem:[%s8035_s0 + $0x38] sm:$0xff]   ;;  %v6180_v55 = vld [vmem:[%s8035_s0 + $0x80] sm:$0xff]  }
  0x13   :  { %898 = vmatprep.mubr.bf16.mxu0 %v8044_v1  ;;  %360 = vmatpush1.bf16.msra.mxu1 %v352_v40  ;;  %v6213_v56 = vld [vmem:[%s8035_s0 + $0x40] sm:$0xff]   ;;  %v6181_v57 = vld [vmem:[%s8035_s0 + $0x88] sm:$0xff]   ;;  %v6182_v59 = vld [vmem:[%s8035_s0 + $0x90] sm:$0xff]  }
  0x14   :  { %5617 = vmatprep.subr.bf16.mxu1 %v6506_v0  ;;  %v6215_v58 = vld [vmem:[%s8035_s0 + $0x48] sm:$0xff]   ;;  %v6217_v60 = vld [vmem:[%s8035_s0 + $0x50] sm:$0xff]   ;;  %v6183_v61 = vld [vmem:[%s8035_s0 + $0x98] sm:$0xff]  }
  0x15   :  { %v6219_v62 = vld [vmem:[%s8035_s0 + $0x58] sm:$0xff]   ;;  %v6184_v63 = vld [vmem:[%s8035_s0 + $0xa0] sm:$0xff]   ;;  %v6186_v4 = vld [vmem:[%s8035_s0 + $0xb0] sm:$0xff]  }
  0x16   :  { %4979 = vmatmul.mubr.msk.bf16.vlgmr.msra.gmra.mrb[0].mxu1 %vm277_vm1, %v6196_v41  ;;  %v6221_v0 = vld [vmem:[%s8035_s0 + $0x60] sm:$0xff]   ;;  %v6187_v6 = vld [vmem:[%s8035_s0 + $0xb8] sm:$0xff]   ;;  %v6192_v10 = vld [vmem:[%s8035_s0 + $0xc8] sm:$0xff]  }
  0x17   :  { %399 = vmatprep.mubr.bf16.mxu1 %v8044_v1  ;;  %5619 = vmatpush1.bf16.msra.mxu1 %v6513_v2  ;;  %v6185_v2 = vld [vmem:[%s8035_s0 + $0xa8] sm:$0xff]   ;;  %v6230_v7 = vld [vmem:[%s8035_s0 + $0x78] sm:$0xff]   ;;  %v6188_v8 = vld [vmem:[%s8035_s0 + $0xc0] sm:$0xff]  }
  0x18   :  { %5618 = vmatprep.subr.msk.bf16.mxu1 %vm350_vm0, %v6519_v3  ;;  %v6223_v3 = vld [vmem:[%s8035_s0 + $0x68] sm:$0xff]   ;;  %v6232_v9 = vld [vmem:[%s8035_s0 + $0x80] sm:$0xff]   ;;  %v6197_v12 = vld [vmem:[%s8035_s0 + $0x18] sm:$0xff]  }
  0x19   :  { %v6234_v11 = vld [vmem:[%s8035_s0 + $0x88] sm:$0xff]   ;;  %v6246_v27 = vld [vmem:[%s8035_s0 + $0xb8] sm:$0xff]   ;;  %v6254_v35 = vld [vmem:[%s8035_s0 + $0x70] sm:$0xff]  }
  0x1a   :  { %5034 = vmatmul.mubr.msk.bf16.gmra.mrb[8].mxu0 %vm277_vm1, %v6147_v14  ;;  %v6198_v13 = vld [vmem:[%s8034_s1 + $0x80] ss:$8 sps:$4 sm:$0xff]   ;;  %v6225_v14 = vld [vmem:[%s8034_s1 + $0x94] ss:$8 sps:$4 sm:$0x3f]  }
  0x1b   :  { %908 = vmatprep.mubr.bf16.mxu0 %v8044_v1  ;;  %5620 = vmatpush1.bf16.msra.mxu1 %v6528_v5  ;;  %v6228_v5 = vld [vmem:[%s8035_s0 + $0x70] sm:$0xff]   ;;  %v6220_v36 = vld [vmem:[%s8035_s0 + $0x68] sm:$0xff]   ;;  %v6258_v39 = vld [vmem:[%s8035_s0 + $0x80] sm:$0xff]  }
  0x1c   :  { %v6222_v38 = vld [vmem:[%s8035_s0 + $0x70] sm:$0xff]   ;;  %v6224_v40 = vld [vmem:[%s8035_s0 + $0x78] sm:$0xff]   ;;  %v6260_v41 = vld [vmem:[%s8035_s0 + $0x88] sm:$0xff]  }
  0x1e   :  { %4980 = vmatmul.mubr.msk.bf16.gmra.mrb[4].mxu1 %vm277_vm1, %v6201_v44  ;;  %v6231_v44 = vld [vmem:[%s8035_s0 + $0x88] sm:$0xff]  }
  0x1f   :  { %409 = vmatprep.mubr.bf16.mxu1 %v8044_v1 }
  0x22   :  { %5035 = vmatmul.mubr.msk.bf16.gmra.mrb[12].mxu0 %vm277_vm1, %v6148_v15  ;;  %v6227_v15 = vld [vmem:[%s8034_s1 + $0x90] ss:$8 sps:$4 sm:$0x3f]  }
  0x23   :  { %918 = vmatprep.mubr.bf16.mxu0 %v8044_v1 }
  0x26   :  { %4981 = vmatmul.mubr.msk.bf16.gmra.mrb[8].mxu1 %vm277_vm1, %v6203_v46  ;;  %v6233_v46 = vld [vmem:[%s8035_s0 + $0x90] sm:$0xff]  }
  0x27   :  { %419 = vmatprep.mubr.bf16.mxu1 %v8044_v1 }
  0x2a   :  { %5036 = vmatmul.mubr.msk.bf16.gmra.mrb[16].mxu0 %vm277_vm1, %v6149_v16  ;;  %v6236_v16 = vld [vmem:[%s8035_s0 + $0x90] sm:$0xff]  }
  0x2b   :  { %928 = vmatprep.mubr.bf16.mxu0 %v8044_v1 }
  0x2e   :  { %4982 = vmatmul.mubr.msk.bf16.gmra.mrb[12].mxu1 %vm277_vm1, %v6205_v48  ;;  %v6235_v48 = vld [vmem:[%s8035_s0 + $0x98] sm:$0xff]  }
  0x2f   :  { %429 = vmatprep.mubr.bf16.mxu1 %v8044_v1 }
  0x32   :  { %5037 = vmatmul.mubr.msk.bf16.gmra.mrb[20].mxu0 %vm277_vm1, %v6150_v17  ;;  %v2662_v17 = vsel %vm350_vm0, %v6227_v15, 0 }
  0x33   :  { %938 = vmatprep.mubr.bf16.mxu0 %v8044_v1 }
  0x36   :  { %4983 = vmatmul.mubr.msk.bf16.gmra.mrb[16].mxu1 %vm277_vm1, %v6207_v50  ;;  %v6237_v50 = vld [vmem:[%s8035_s0 + $0xa0] sm:$0xff]  }
  0x37   :  { %439 = vmatprep.mubr.bf16.mxu1 %v8044_v1 }
  0x3a   :  { %5038 = vmatmul.mubr.msk.bf16.gmra.mrb[24].mxu0 %vm277_vm1, %v6151_v18  ;;  %v6202_v18 = vld [vmem:[%s8035_s0 + $0x20] sm:$0xff]  }
  0x3b   :  { %948 = vmatprep.mubr.bf16.mxu0 %v8044_v1 }
  0x3e   :  { %4984 = vmatmul.mubr.msk.bf16.gmra.mrb[20].mxu1 %vm277_vm1, %v6209_v52  ;;  %v6239_v52 = vld [vmem:[%s8035_s0 + $0xa8] sm:$0xff]  }
  0x3f   :  { %449 = vmatprep.mubr.bf16.mxu1 %v8044_v1 }
  0x42   :  { %5039 = vmatmul.mubr.msk.bf16.gmra.mrb[28].mxu0 %vm277_vm1, %v6155_v19  ;;  %v6238_v19 = vld [vmem:[%s8035_s0 + $0x98] sm:$0xff]  }
  0x43   :  { %958 = vmatprep.mubr.bf16.mxu0 %v8044_v1 }
  0x46   :  { %4985 = vmatmul.mubr.msk.bf16.gmra.mrb[24].mxu1 %vm277_vm1, %v6211_v54  ;;  %v6241_v54 = vld [vmem:[%s8035_s0 + $0xb0] sm:$0xff]  }
  0x47   :  { %459 = vmatprep.mubr.bf16.mxu1 %v8044_v1 }
  0x4a   :  { %5040 = vmatmul.mubr.msk.bf16.gmra.mrb[32].mxu0 %vm277_vm1, %v6156_v20  ;;  %v6204_v20 = vld [vmem:[%s8035_s0 + $0x28] sm:$0xff]  }
  0x4b   :  { %968 = vmatprep.mubr.bf16.mxu0 %v8044_v1 }
  0x4e   :  { %4986 = vmatmul.mubr.msk.bf16.gmra.mrb[28].mxu1 %vm277_vm1, %v6213_v56  ;;  %v6245_v56 = vld [vmem:[%s8035_s0 + $0xc0] sm:$0xff]  }
  0x4f   :  { %469 = vmatprep.mubr.bf16.mxu1 %v8044_v1 }
  0x52   :  { %5041 = vmatmul.mubr.msk.bf16.gmra.mrb[36].mxu0 %vm277_vm1, %v6157_v21  ;;  %v6240_v21 = vld [vmem:[%s8035_s0 + $0xa0] sm:$0xff]  }
  0x53   :  { %978 = vmatprep.mubr.bf16.mxu0 %v8044_v1 }
  0x56   :  { %4987 = vmatmul.mubr.msk.bf16.gmra.mrb[32].mxu1 %vm277_vm1, %v6215_v58 }
  0x57   :  { %479 = vmatprep.mubr.bf16.mxu1 %v8044_v1 }
  0x5a   :  { %5042 = vmatmul.mubr.msk.bf16.gmra.mrb[40].mxu0 %vm277_vm1, %v6158_v22  ;;  %v6206_v22 = vld [vmem:[%s8035_s0 + $0x30] sm:$0xff]  }
  0x5b   :  { %988 = vmatprep.mubr.bf16.mxu0 %v8044_v1 }
  0x5e   :  { %4988 = vmatmul.mubr.msk.bf16.gmra.mrb[36].mxu1 %vm277_vm1, %v6217_v60 }
  0x5f   :  { %489 = vmatprep.mubr.bf16.mxu1 %v8044_v1 }
  0x62   :  { %5043 = vmatmul.mubr.msk.bf16.gmra.mrb[44].mxu0 %vm277_vm1, %v6159_v23  ;;  %v6242_v23 = vld [vmem:[%s8035_s0 + $0xa8] sm:$0xff]  }
  0x63   :  { %1421 = vmatprep.mubr.bf16.mxu0 %v8044_v1 }
  0x66   :  { %4989 = vmatmul.mubr.msk.bf16.gmra.mrb[40].mxu1 %vm277_vm1, %v6219_v62  ;;  %v6249_v62 = vld [vmem:[%s8035_s0 + $0xd0] sm:$0xff]  }
  0x67   :  { %499 = vmatprep.mubr.bf16.mxu1 %v8044_v1 }
  0x6a   :  { %5137 = vmatmul.mubr.msk.bf16.vlgmr.msra.gmra.mrb[0].mxu0 %vm277_vm1, %v6160_v24  ;;  %v6208_v24 = vld [vmem:[%s8035_s0 + $0x38] sm:$0xff]  }
  0x6b   :  { %2029 = vmatpush1.bf16.msra.mxu0 %v6161_v25  ;;  %1431 = vmatprep.mubr.bf16.mxu0 %v8044_v1  ;;  %v6244_v25 = vld [vmem:[%s8035_s0 + $0xb0] sm:$0xff]  }
  0x6c   :  { %5241 = vmatprep.subr.msk.bf16.mxu0 %vm350_vm0, %v6176_v26  ;;  %v6210_v26 = vld [vmem:[%s8035_s0 + $0x40] sm:$0xff]  }
  0x6e   :  { %4990 = vmatmul.mubr.msk.bf16.gmra.mrb[44].mxu1 %vm277_vm1, %v6221_v0 }
  0x6f   :  { %2031 = vmatpush1.bf16.msra.mxu0 %v2023_v28  ;;  %509 = vmatprep.mubr.bf16.mxu1 %v8044_v1  ;;  %v6212_v28 = vld [vmem:[%s8035_s0 + $0x48] sm:$0xff]  }
  0x70   :  { %2667 = vmatprep.subr.bf16.mxu0 %v6200_v43  ;;  %v6262_v43 = vld [vmem:[%s8035_s0 + $0x90] sm:$0xff]  }
  0x72   :  { %5138 = vmatmul.mubr.msk.bf16.gmra.mrb[4].mxu0 %vm277_vm1, %v6164_v29  ;;  %v6248_v29 = vld [vmem:[%s8035_s0 + $0xc0] sm:$0xff]  }
  0x73   :  { %1441 = vmatprep.mubr.bf16.mxu0 %v8044_v1 }
  0x76   :  { %4991 = vmatmul.mubr.msk.bf16.gmra.mrb[48].mxu1 %vm277_vm1, %v6223_v3 }
  0x77   :  { %519 = vmatprep.mubr.bf16.mxu1 %v8044_v1 }
  0x7a   :  { %5139 = vmatmul.mubr.msk.bf16.gmra.mrb[8].mxu0 %vm277_vm1, %v6165_v30  ;;  %v6214_v30 = vld [vmem:[%s8035_s0 + $0x50] sm:$0xff]  }
  0x7b   :  { %1451 = vmatprep.mubr.bf16.mxu0 %v8044_v1 }
  0x7e   :  { %4992 = vmatmul.mubr.msk.bf16.gmra.mrb[52].mxu1 %vm277_vm1, %v6228_v5 }
  0x7f   :  { %529 = vmatprep.mubr.bf16.mxu1 %v8044_v1 }
  0x82   :  { %5140 = vmatmul.mubr.msk.bf16.gmra.mrb[12].mxu0 %vm277_vm1, %v6166_v31  ;;  %v6250_v31 = vld [vmem:[%s8035_s0 + $0x60] sm:$0xff]  }
  0x83   :  { %1461 = vmatprep.mubr.bf16.mxu0 %v8044_v1 }
  0x86   :  { %4993 = vmatmul.mubr.msk.bf16.gmra.mrb[56].mxu1 %vm277_vm1, %v6230_v7 }
  0x87   :  { %539 = vmatprep.mubr.bf16.mxu1 %v8044_v1 }
  0x8a   :  { %5141 = vmatmul.mubr.msk.bf16.gmra.mrb[16].mxu0 %vm277_vm1, %v6167_v32  ;;  %v6216_v32 = vld [vmem:[%s8035_s0 + $0x58] sm:$0xff]  }
  0x8b   :  { %1471 = vmatprep.mubr.bf16.mxu0 %v8044_v1 }
  0x8e   :  { %4994 = vmatmul.mubr.msk.bf16.gmra.mrb[60].mxu1 %vm277_vm1, %v6232_v9  ;;  %v6253_v9 = vld [vmem:[%s8035_s0 + $0x28] sm:$0xff]  }
  0x8f   :  { %549 = vmatprep.mubr.bf16.mxu1 %v8044_v1 }
  0x92   :  { %5142 = vmatmul.mubr.msk.bf16.gmra.mrb[20].mxu0 %vm277_vm1, %v6168_v33  ;;  %v6252_v33 = vld [vmem:[%s8035_s0 + $0x68] sm:$0xff]  }
  0x93   :  { %1481 = vmatprep.mubr.bf16.mxu0 %v8044_v1 }
  0x96   :  { %4995 = vmatmul.mubr.msk.bf16.gmra.mrb[64].mxu1 %vm277_vm1, %v6234_v11 }
  0x97   :  { %559 = vmatprep.mubr.bf16.mxu1 %v8044_v1 }
  0x9a   :  { %5143 = vmatmul.mubr.msk.bf16.gmra.mrb[24].mxu0 %vm277_vm1, %v6169_v34  ;;  %v6218_v34 = vld [vmem:[%s8035_s0 + $0x60] sm:$0xff]  }
  0x9b   :  { %1491 = vmatprep.mubr.bf16.mxu0 %v8044_v1 }
  0x9e   :  { %4996 = vmatmul.mubr.msk.bf16.gmra.mrb[68].mxu1 %vm277_vm1, %v6236_v16 }
  0x9f   :  { %569 = vmatprep.mubr.bf16.mxu1 %v8044_v1 }
  0xa2   :  { %5144 = vmatmul.mubr.msk.bf16.gmra.mrb[28].mxu0 %vm277_vm1, %v6170_v37  ;;  %v6256_v37 = vld [vmem:[%s8035_s0 + $0x78] sm:$0xff]  }
  0xa3   :  { %1501 = vmatprep.mubr.bf16.mxu0 %v8044_v1 }
  0xa6   :  { %4997 = vmatmul.mubr.msk.bf16.gmra.mrb[72].mxu1 %vm277_vm1, %v6238_v19  ;;  %v6257_v19 = vld [vmem:[%s8035_s0 + $0x38] sm:$0xff]  }
  0xa7   :  { %579 = vmatprep.mubr.bf16.mxu1 %v8044_v1 }
  0xaa   :  { %5145 = vmatmul.mubr.msk.bf16.gmra.mrb[32].mxu0 %vm277_vm1, %v6171_v42  ;;  %v6229_v42 = vld [vmem:[%s8035_s0 + $0x80] sm:$0xff]  }
  0xab   :  { %1511 = vmatprep.mubr.bf16.mxu0 %v8044_v1 }
  0xae   :  { %4998 = vmatmul.mubr.msk.bf16.gmra.mrb[76].mxu1 %vm277_vm1, %v6240_v21 }
  0xaf   :  { %589 = vmatprep.mubr.bf16.mxu1 %v8044_v1 }
  0xb2   :  { %5146 = vmatmul.mubr.msk.bf16.gmra.mrb[36].mxu0 %vm277_vm1, %v6172_v45  ;;  %v6264_v45 = vld [vmem:[%s8035_s0 + $0x98] sm:$0xff]  }
  0xb3   :  { %1521 = vmatprep.mubr.bf16.mxu0 %v8044_v1 }
  0xb6   :  { %4999 = vmatmul.mubr.msk.bf16.gmra.mrb[80].mxu1 %vm277_vm1, %v6242_v23 }
  0xb7   :  { %599 = vmatprep.mubr.bf16.mxu1 %v8044_v1 }
  0xba   :  { %5147 = vmatmul.mubr.msk.bf16.gmra.mrb[40].mxu0 %vm277_vm1, %v6173_v47  ;;  %v6266_v47 = vld [vmem:[%s8035_s0 + $0xa0] sm:$0xff]  }
  0xbb   :  { %1531 = vmatprep.mubr.bf16.mxu0 %v8044_v1 }
  0xbe   :  { %5000 = vmatmul.mubr.msk.bf16.gmra.mrb[84].mxu1 %vm277_vm1, %v6244_v25 }
  0xbf   :  { %609 = vmatprep.mubr.bf16.mxu1 %v8044_v1 }
  0xc2   :  { %5148 = vmatmul.mubr.msk.bf16.gmra.mrb[44].mxu0 %vm277_vm1, %v6174_v49  ;;  %v6268_v49 = vld [vmem:[%s8035_s0 + $0xa8] sm:$0xff]  }
  0xc3   :  { %1541 = vmatprep.mubr.bf16.mxu0 %v8044_v1 }
  0xc6   :  { %5001 = vmatmul.mubr.msk.bf16.gmra.mrb[88].mxu1 %vm277_vm1, %v6246_v27 }
  0xc7   :  { %619 = vmatprep.mubr.bf16.mxu1 %v8044_v1 }
  0xca   :  { %5149 = vmatmul.mubr.msk.bf16.gmra.mrb[48].mxu0 %vm277_vm1, %v6175_v51  ;;  %v6270_v51 = vld [vmem:[%s8035_s0 + $0xb0] sm:$0xff]  }
  0xcb   :  { %1551 = vmatprep.mubr.bf16.mxu0 %v8044_v1 }
  0xce   :  { %5002 = vmatmul.mubr.msk.bf16.gmra.mrb[92].mxu1 %vm277_vm1, %v6248_v29  ;;  %v6261_v29 = vld [vmem:[%s8035_s0 + $0x48] sm:$0xff]  }
  0xcf   :  { %998 = vmatprep.mubr.bf16.mxu1 %v8044_v1 }
  0xd2   :  { %5150 = vmatmul.mubr.msk.bf16.gmra.mrb[52].mxu0 %vm277_vm1, %v6179_v53  ;;  %v6272_v53 = vld [vmem:[%s8035_s0 + $0xb8] sm:$0xff]  }
  0xd3   :  { %1561 = vmatprep.mubr.bf16.mxu0 %v8044_v1 }
  0xd6   :  { %5044 = vmatmul.mubr.msk.bf16.vlgmr.msra.gmra.mrb[48].mxu1 %vm277_vm1, %v6250_v31 }
  0xd7   :  { %1008 = vmatprep.mubr.bf16.mxu1 %v8044_v1 }
  0xda   :  { %5151 = vmatmul.mubr.msk.bf16.gmra.mrb[56].mxu0 %vm277_vm1, %v6180_v55  ;;  %v6243_v55 = vld [vmem:[%s8035_s0 + $0xb8] sm:$0xff]  }
  0xdb   :  { %1571 = vmatprep.mubr.bf16.mxu0 %v8044_v1 }
  0xde   :  { %5045 = vmatmul.mubr.msk.bf16.gmra.mrb[52].mxu1 %vm277_vm1, %v6252_v33 }
  0xdf   :  { %1018 = vmatprep.mubr.bf16.mxu1 %v8044_v1 }
  0xe2   :  { %5152 = vmatmul.mubr.msk.bf16.gmra.mrb[60].mxu0 %vm277_vm1, %v6181_v57  ;;  %v6247_v57 = vld [vmem:[%s8035_s0 + $0xc8] sm:$0xff]  }
  0xe3   :  { %1581 = vmatprep.mubr.bf16.mxu0 %v8044_v1 }
  0xe6   :  { %5046 = vmatmul.mubr.msk.bf16.gmra.mrb[56].mxu1 %vm277_vm1, %v6254_v35 }
  0xe7   :  { %1028 = vmatprep.mubr.bf16.mxu1 %v8044_v1 }
  0xe9   :  { %v7066_v58 = vpop.f32.mrb[0].mxu1 }
  0xea   :  { %5153 = vmatmul.mubr.msk.bf16.gmra.mrb[64].mxu0 %vm277_vm1, %v6182_v59  ;;  %v7069_v59 = vpop.f32.mrb[1].mxu1 }
  0xeb   :  { %1591 = vmatprep.mubr.bf16.mxu0 %v8044_v1  ;;  %v7071_v60 = vpop.f32.mrb[2].mxu1 }
  0xee   :  { %5047 = vmatmul.mubr.msk.bf16.gmra.mrb[60].mxu1 %vm277_vm1, %v6256_v37 }
  0xef   :  { %1038 = vmatprep.mubr.bf16.mxu1 %v8044_v1 }
  0xf2   :  { %5154 = vmatmul.mubr.msk.bf16.gmra.mrb[68].mxu0 %vm277_vm1, %v6183_v61  ;;  %v7073_v61 = vpop.f32.mrb[3].mxu1 }
  0xf3   :  { %1601 = vmatprep.mubr.bf16.mxu0 %v8044_v1 }
  0xf6   :  { %5048 = vmatmul.mubr.msk.bf16.gmra.mrb[64].mxu1 %vm277_vm1, %v6258_v39  ;;  %v6265_v39 = vld [vmem:[%s8035_s0 + $0x58] sm:$0xff]  }
  0xf7   :  { %1048 = vmatprep.mubr.bf16.mxu1 %v8044_v1 }
  0xfa   :  { %5155 = vmatmul.mubr.msk.bf16.gmra.mrb[72].mxu0 %vm277_vm1, %v6184_v63  ;;  %v7079_v63 = vpop.f32.mrb[4].mxu1 }
  0xfb   :  { %1611 = vmatprep.mubr.bf16.mxu0 %v8044_v1  ;;  %v7082_v0 = vpop.f32.mrb[5].mxu1 }
  0xfe   :  { %5049 = vmatmul.mubr.msk.bf16.gmra.mrb[68].mxu1 %vm277_vm1, %v6260_v41 }
  0xff   :  { %1058 = vmatprep.mubr.bf16.mxu1 %v8044_v1 }
 0x102   :  { %5156 = vmatmul.mubr.msk.bf16.gmra.mrb[76].mxu0 %vm277_vm1, %v6185_v2  ;;  %v7084_v2 = vpop.f32.mrb[6].mxu1 }
 0x103   :  { %1621 = vmatprep.mubr.bf16.mxu0 %v8044_v1  ;;  %v7086_v3 = vpop.f32.mrb[7].mxu1 }
 0x104   :  { %v7092_v5 = vpop.f32.mrb[8].mxu1 }
 0x106   :  { %5050 = vmatmul.mubr.msk.bf16.gmra.mrb[72].mxu1 %vm277_vm1, %v6262_v43 }
 0x107   :  { %1068 = vmatprep.mubr.bf16.mxu1 %v8044_v1 }
 0x10a   :  { %5157 = vmatmul.mubr.msk.bf16.gmra.mrb[80].mxu0 %vm277_vm1, %v6186_v4  ;;  %v6251_v4 = vld [vmem:[%s8035_s0 + $0x20] sm:$0xff]  }
 0x10b   :  { %1631 = vmatprep.mubr.bf16.mxu0 %v8044_v1 }
 0x10e   :  { %5051 = vmatmul.mubr.msk.bf16.gmra.mrb[76].mxu1 %vm277_vm1, %v6264_v45 }
 0x10f   :  { %1078 = vmatprep.mubr.bf16.mxu1 %v8044_v1 }
 0x112   :  { %5158 = vmatmul.mubr.msk.bf16.gmra.mrb[84].mxu0 %vm277_vm1, %v6187_v6  ;;  %v7095_v6 = vpop.f32.mrb[9].mxu1 }
 0x113   :  { %1641 = vmatprep.mubr.bf16.mxu0 %v8044_v1  ;;  %v7097_v7 = vpop.f32.mrb[10].mxu1 }
 0x116   :  { %5052 = vmatmul.mubr.msk.bf16.gmra.mrb[80].mxu1 %vm277_vm1, %v6266_v47 }
 0x117   :  { %1088 = vmatprep.mubr.bf16.mxu1 %v8044_v1 }
 0x11a   :  { %5159 = vmatmul.mubr.msk.bf16.gmra.mrb[88].mxu0 %vm277_vm1, %v6188_v8  ;;  %v7099_v8 = vpop.f32.mrb[11].mxu1 }
 0x11b   :  { %1651 = vmatprep.mubr.bf16.mxu0 %v8044_v1 }
 0x11e   :  { %5053 = vmatmul.mubr.msk.bf16.gmra.mrb[84].mxu1 %vm277_vm1, %v6268_v49 }
 0x11f   :  { %1098 = vmatprep.mubr.bf16.mxu1 %v8044_v1 }
 0x122   :  { %5160 = vmatmul.mubr.msk.bf16.gmra.mrb[92].mxu0 %vm277_vm1, %v6192_v10  ;;  %v7105_v10 = vpop.f32.mrb[12].mxu1 }
 0x123   :  { %2060 = vmatprep.mubr.bf16.mxu0 %v8044_v1  ;;  %v7108_v11 = vpop.f32.mrb[13].mxu1 }
 0x126   :  { %5054 = vmatmul.mubr.msk.bf16.gmra.mrb[88].mxu1 %vm277_vm1, %v6270_v51 }
 0x127   :  { %1108 = vmatprep.mubr.bf16.mxu1 %v8044_v1 }
 0x12a   :  { %5242 = vmatmul.mubr.msk.bf16.vlgmr.msra.gmra.mrb[0].mxu0 %vm277_vm1, %v6197_v12  ;;  %v7110_v12 = vpop.f32.mrb[14].mxu1 }
 0x12b   :  { %2668 = vmatpush1.bf16.msra.mxu0 %v6198_v13  ;;  %2070 = vmatprep.mubr.bf16.mxu0 %v8044_v1  ;;  %v7112_v13 = vpop.f32.mrb[15].mxu1 }
 0x12c   :  { %5346 = vmatprep.subr.msk.bf16.mxu0 %vm350_vm0, %v6225_v14  ;;  %v6255_v14 = vld [vmem:[%s8035_s0 + $0x30] sm:$0xff]   ;;  %v7118_v15 = vpop.f32.mrb[16].mxu1 }
 0x12d   :  { %v7121_v16 = vpop.f32.mrb[17].mxu1 }
 0x12e   :  { %5055 = vmatmul.mubr.msk.bf16.gmra.mrb[92].mxu1 %vm277_vm1, %v6272_v53  ;;  %v6269_v53 = vld [vmem:[%s8035_s0 + $0x68] sm:$0xff]  }
 0x12f   :  { %2670 = vmatpush1.bf16.msra.mxu0 %v2662_v17  ;;  %3368 = vmatprep.mubr.bf16.mxu1 %v8044_v1  ;;  %v7123_v17 = vpop.f32.mrb[18].mxu1 }
 0x132   :  { %5243 = vmatmul.mubr.msk.bf16.gmra.mrb[4].mxu0 %vm277_vm1, %v6202_v18  ;;  %v7125_v18 = vpop.f32.mrb[19].mxu1 }
 0x133   :  { %2080 = vmatprep.mubr.bf16.mxu0 %v8044_v1 }
 0x13a   :  { %5244 = vmatmul.mubr.msk.bf16.gmra.mrb[8].mxu0 %vm277_vm1, %v6204_v20  ;;  %v7131_v20 = vpop.f32.mrb[20].mxu1 }
 0x13b   :  { %2090 = vmatprep.mubr.bf16.mxu0 %v8044_v1  ;;  %v7134_v21 = vpop.f32.mrb[21].mxu1 }
 0x142   :  { %5245 = vmatmul.mubr.msk.bf16.gmra.mrb[12].mxu0 %vm277_vm1, %v6206_v22  ;;  %v7136_v22 = vpop.f32.mrb[22].mxu1 }
 0x143   :  { %2100 = vmatprep.mubr.bf16.mxu0 %v8044_v1  ;;  %v7138_v23 = vpop.f32.mrb[23].mxu1 }
 0x144   :  { %v7144_v25 = vpop.f32.mrb[24].mxu1 }
 0x14a   :  { %5246 = vmatmul.mubr.msk.bf16.gmra.mrb[16].mxu0 %vm277_vm1, %v6208_v24  ;;  %v6259_v24 = vld [vmem:[%s8035_s0 + $0x40] sm:$0xff]  }
 0x14b   :  { %2110 = vmatprep.mubr.bf16.mxu0 %v8044_v1 }
 0x152   :  { %5247 = vmatmul.mubr.msk.bf16.gmra.mrb[20].mxu0 %vm277_vm1, %v6210_v26  ;;  %v7147_v26 = vpop.f32.mrb[25].mxu1 }
 0x153   :  { %2120 = vmatprep.mubr.bf16.mxu0 %v8044_v1  ;;  %v7149_v27 = vpop.f32.mrb[26].mxu1 }
 0x15a   :  { %5248 = vmatmul.mubr.msk.bf16.gmra.mrb[24].mxu0 %vm277_vm1, %v6212_v28  ;;  %v7151_v28 = vpop.f32.mrb[27].mxu1 }
 0x15b   :  { %2130 = vmatprep.mubr.bf16.mxu0 %v8044_v1 }
 0x162   :  { %5249 = vmatmul.mubr.msk.bf16.gmra.mrb[28].mxu0 %vm277_vm1, %v6214_v30  ;;  %v7157_v30 = vpop.f32.mrb[28].mxu1 }
 0x163   :  { %2140 = vmatprep.mubr.bf16.mxu0 %v8044_v1  ;;  %v7160_v31 = vpop.f32.mrb[29].mxu1 }
 0x16a   :  { %5250 = vmatmul.mubr.msk.bf16.gmra.mrb[32].mxu0 %vm277_vm1, %v6216_v32  ;;  %v7162_v32 = vpop.f32.mrb[30].mxu1 }
 0x16b   :  { %2150 = vmatprep.mubr.bf16.mxu0 %v8044_v1  ;;  %v7164_v33 = vpop.f32.mrb[31].mxu1 }
 0x16c   :  { %v7170_v35 = vpop.f32.mrb[32].mxu1 }
 0x172   :  { %5251 = vmatmul.mubr.msk.bf16.gmra.mrb[36].mxu0 %vm277_vm1, %v6218_v34  ;;  %v6263_v34 = vld [vmem:[%s8035_s0 + $0x50] sm:$0xff]  }
 0x173   :  { %2160 = vmatprep.mubr.bf16.mxu0 %v8044_v1 }
 0x17a   :  { %5252 = vmatmul.mubr.msk.bf16.gmra.mrb[40].mxu0 %vm277_vm1, %v6220_v36  ;;  %v7173_v36 = vpop.f32.mrb[33].mxu1 }
 0x17b   :  { %2170 = vmatprep.mubr.bf16.mxu0 %v8044_v1  ;;  %v7175_v37 = vpop.f32.mrb[34].mxu1 }
 0x182   :  { %5253 = vmatmul.mubr.msk.bf16.gmra.mrb[44].mxu0 %vm277_vm1, %v6222_v38  ;;  %v7177_v38 = vpop.f32.mrb[35].mxu1 }
 0x183   :  { %2180 = vmatprep.mubr.bf16.mxu0 %v8044_v1 }
 0x18a   :  { %5254 = vmatmul.mubr.msk.bf16.gmra.mrb[48].mxu0 %vm277_vm1, %v6224_v40  ;;  %v7183_v40 = vpop.f32.mrb[36].mxu1 }
 0x18b   :  { %2190 = vmatprep.mubr.bf16.mxu0 %v8044_v1  ;;  %v7186_v41 = vpop.f32.mrb[37].mxu1 }
 0x192   :  { %5255 = vmatmul.mubr.msk.bf16.gmra.mrb[52].mxu0 %vm277_vm1, %v6229_v42  ;;  %v7188_v42 = vpop.f32.mrb[38].mxu1 }
 0x193   :  { %2200 = vmatprep.mubr.bf16.mxu0 %v8044_v1  ;;  %v7190_v43 = vpop.f32.mrb[39].mxu1 }
 0x194   :  { %v7195_v45 = vpop.f32.mrb[40].mxu1 }
 0x19a   :  { %5256 = vmatmul.mubr.msk.bf16.gmra.mrb[56].mxu0 %vm277_vm1, %v6231_v44  ;;  %v6267_v44 = vld [vmem:[%s8035_s0 + $0x60] sm:$0xff]  }
 0x19b   :  { %2210 = vmatprep.mubr.bf16.mxu0 %v8044_v1 }
 0x1a2   :  { %5257 = vmatmul.mubr.msk.bf16.gmra.mrb[60].mxu0 %vm277_vm1, %v6233_v46  ;;  %v7197_v46 = vpop.f32.mrb[41].mxu1 }
 0x1a3   :  { %2220 = vmatprep.mubr.bf16.mxu0 %v8044_v1  ;;  %v7199_v47 = vpop.f32.mrb[42].mxu1 }
 0x1aa   :  { %5258 = vmatmul.mubr.msk.bf16.gmra.mrb[64].mxu0 %vm277_vm1, %v6235_v48  ;;  %v7201_v48 = vpop.f32.mrb[43].mxu1 }
 0x1ab   :  { %2230 = vmatprep.mubr.bf16.mxu0 %v8044_v1  ;;  %v7204_v49 = vpop.f32.mrb[44].mxu1 }
 0x1b2   :  { %5259 = vmatmul.mubr.msk.bf16.gmra.mrb[68].mxu0 %vm277_vm1, %v6237_v50  ;;  %v7207_v50 = vpop.f32.mrb[45].mxu1 }
 0x1b3   :  { %2240 = vmatprep.mubr.bf16.mxu0 %v8044_v1  ;;  %v7209_v51 = vpop.f32.mrb[46].mxu1 }
 0x1ba   :  { %5260 = vmatmul.mubr.msk.bf16.gmra.mrb[72].mxu0 %vm277_vm1, %v6239_v52  ;;  %v7211_v52 = vpop.f32.mrb[47].mxu1 }
 0x1bb   :  { %2250 = vmatprep.mubr.bf16.mxu0 %v8044_v1 }
 0x1c2   :  { %5261 = vmatmul.mubr.msk.bf16.gmra.mrb[76].mxu0 %vm277_vm1, %v6241_v54  ;;  %v6271_v54 = vld [vmem:[%s8035_s0 + $0x70] sm:$0xff]  }
 0x1c3   :  { %2260 = vmatprep.mubr.bf16.mxu0 %v8044_v1 }
 0x1ca   :  { %5262 = vmatmul.mubr.msk.bf16.gmra.mrb[80].mxu0 %vm277_vm1, %v6243_v55  ;;  %v7222_v55 = vpop.f32.mrb[48].mxu1 }
 0x1cb   :  { %2270 = vmatprep.mubr.bf16.mxu0 %v8044_v1 }
 0x1d2   :  { %5263 = vmatmul.mubr.msk.bf16.gmra.mrb[84].mxu0 %vm277_vm1, %v6245_v56  ;;  %v7225_v56 = vpop.f32.mrb[49].mxu1 }
 0x1d3   :  { %2280 = vmatprep.mubr.bf16.mxu0 %v8044_v1  ;;  %8046 = vst [vmem:[#allocation2_spill] sm:$0xff] %v7225_v56 }
 0x1da   :  { %5264 = vmatmul.mubr.msk.bf16.gmra.mrb[88].mxu0 %vm277_vm1, %v6247_v57  ;;  %v7227_v57 = vpop.f32.mrb[50].mxu1 }
 0x1db   :  { %2290 = vmatprep.mubr.bf16.mxu0 %v8044_v1  ;;  %8047 = vst [vmem:[#allocation3_spill] sm:$0xff] %v7227_v57  ;;  %v7441_v57 = vld [vmem:[%s8037_s2] ss:$0 sm:$0xff] }
 0x1e2   :  { %5265 = vmatmul.mubr.msk.bf16.gmra.mrb[92].mxu0 %vm277_vm1, %v6249_v62  ;;  %v7229_v62 = vpop.f32.mrb[51].mxu1 }
 0x1e3   :  { %2699 = vmatprep.mubr.bf16.mxu0 %v8044_v1  ;;  %8048 = vst [vmem:[#allocation4_spill] sm:$0xff] %v7229_v62 }
 0x1ea   :  { %5347 = vmatmul.mubr.msk.bf16.vlgmr.msra.gmra.mrb[0].mxu0 %vm277_vm1, %v6251_v4  ;;  %v6273_v4 = vld [vmem:[%s8035_s0 + $0x78] sm:$0xff]  }
 0x1eb   :  { %2709 = vmatprep.mubr.bf16.mxu0 %v8044_v1 }
 0x1f2   :  { %5348 = vmatmul.mubr.msk.bf16.gmra.mrb[4].mxu0 %vm277_vm1, %v6253_v9  ;;  %v6286_v9 = vld [vmem:[%s8036_s3 + $0x80] ss:$8 sps:$4 sm:$0xff]  }
 0x1f3   :  { %2719 = vmatprep.mubr.bf16.mxu0 %v8044_v1 }
 0x1fa   :  { %5349 = vmatmul.mubr.msk.bf16.gmra.mrb[8].mxu0 %vm277_vm1, %v6255_v14  ;;  %v6288_v14 = vld [vmem:[%s8036_s3 + $0x84] ss:$8 sps:$4 sm:$0xff]  }
 0x1fb   :  { %2729 = vmatprep.mubr.bf16.mxu0 %v8044_v1  ;;  %3336 = vmatprep.subr.bf16.mxu1 %v6288_v14  ;;  %v6275_v14 = vld [vmem:[%s8035_s0 + $0x88] sm:$0xff]  }
 0x1fc   :  { %3337 = vmatpush1.bf16.msra.mxu1 %v6286_v9  ;;  %v6294_v9 = vld [vmem:[%s8036_s3 + $0xa4] ss:$8 sps:$4 sm:$0xff]  }
 0x202   :  { %5350 = vmatmul.mubr.msk.bf16.gmra.mrb[12].mxu0 %vm277_vm1, %v6257_v19  ;;  %v7241_v19 = vpop.f32.mrb[52].mxu1 }
 0x203   :  { %2739 = vmatprep.mubr.bf16.mxu0 %v8044_v1  ;;  %8049 = vst [vmem:[#allocation5_spill] sm:$0xff] %v7241_v19 }
 0x20a   :  { %5351 = vmatmul.mubr.msk.bf16.gmra.mrb[16].mxu0 %vm277_vm1, %v6259_v24  ;;  %v7244_v24 = vpop.f32.mrb[53].mxu1 }
 0x20b   :  { %2749 = vmatprep.mubr.bf16.mxu0 %v8044_v1  ;;  %8050 = vst [vmem:[#allocation6_spill] sm:$0xff] %v7244_v24 }
 0x212   :  { %5352 = vmatmul.mubr.msk.bf16.gmra.mrb[20].mxu0 %vm277_vm1, %v6261_v29  ;;  %v6274_v29 = vld [vmem:[%s8035_s0 + $0x80] sm:$0xff]  }
 0x213   :  { %2759 = vmatprep.mubr.bf16.mxu0 %v8044_v1 }
 0x21a   :  { %5353 = vmatmul.mubr.msk.bf16.gmra.mrb[24].mxu0 %vm277_vm1, %v6263_v34  ;;  %v7249_v34 = vpop.f32.mrb[54].mxu1 }
 0x21b   :  { %2769 = vmatprep.mubr.bf16.mxu0 %v8044_v1  ;;  %8051 = vst [vmem:[#allocation7_spill] sm:$0xff] %v7249_v34 }
 0x222   :  { %5354 = vmatmul.mubr.msk.bf16.gmra.mrb[28].mxu0 %vm277_vm1, %v6265_v39  ;;  %v7251_v39 = vpop.f32.mrb[55].mxu1 }
 0x223   :  { %2779 = vmatprep.mubr.bf16.mxu0 %v8044_v1  ;;  %8052 = vst [vmem:[#allocation8_spill] sm:$0xff] %v7251_v39 }
 0x22a   :  { %5355 = vmatmul.mubr.msk.bf16.gmra.mrb[32].mxu0 %vm277_vm1, %v6267_v44  ;;  %v6291_v44 = vld [vmem:[%s8036_s3 + $0x94] ss:$8 sps:$4 sm:$0xff]  }
 0x22b   :  { %2789 = vmatprep.mubr.bf16.mxu0 %v8044_v1  ;;  %3338 = vmatprep.subr.bf16.mxu1 %v6291_v44 }
 0x232   :  { %5356 = vmatmul.mubr.msk.bf16.gmra.mrb[36].mxu0 %vm277_vm1, %v6269_v53  ;;  %v6289_v53 = vld [vmem:[%s8036_s3 + $0x90] ss:$8 sps:$4 sm:$0xff]  }
 0x233   :  { %2799 = vmatprep.mubr.bf16.mxu0 %v8044_v1  ;;  %3339 = vmatpush1.bf16.msra.mxu1 %v6289_v53  ;;  %v6297_v53 = vld [vmem:[%s8036_s3 + $0xb4] ss:$8 sps:$4 sm:$0xff]  }
 0x234   :  { %3340 = vmatprep.subr.bf16.mxu1 %v6294_v9 }
 0x23a   :  { %5357 = vmatmul.mubr.msk.bf16.gmra.mrb[40].mxu0 %vm277_vm1, %v6271_v54  ;;  %v7260_v54 = vpop.f32.mrb[56].mxu1 }
 0x23b   :  { %2809 = vmatprep.mubr.bf16.mxu0 %v8044_v1  ;;  %8053 = vst [vmem:[#allocation9_spill] sm:$0xff] %v7260_v54 }
 0x242   :  { %5358 = vmatmul.mubr.msk.bf16.gmra.mrb[44].mxu0 %vm277_vm1, %v6273_v4  ;;  %v7263_v4 = vpop.f32.mrb[57].mxu1 }
 0x243   :  { %2819 = vmatprep.mubr.bf16.mxu0 %v8044_v1  ;;  %8054 = vst [vmem:[#allocation10_spill] sm:$0xff] %v7263_v4  ;;  %v7271_v39 = vpop.f32.mrb[58].mxu1  ;;  %v8058_v4 = vmov 0  }
 0x244   :  { %8055 = vst [vmem:[#allocation11_spill] sm:$0xff] %v7271_v39  ;;  %v7276_v44 = vpop.f32.mrb[59].mxu1 }
 0x245   :  { %8056 = vst [vmem:[#allocation12_spill] sm:$0xff] %v7276_v44  ;;  %v7285_v39 = vpop.f32.mrb[60].mxu1  ;;  %v6276_v44 = vld [vmem:[%s8035_s0 + $0x90] sm:$0xff]  }
 0x246   :  { %8057 = vst [vmem:[#allocation13_spill] sm:$0xff] %v7285_v39  ;;  %v7288_v9 = vpop.f32.mrb[61].mxu1  ;;  %v6304_v39 = vld [vmem:[%s8036_s3 + $0xe0] ss:$8 sps:$4 sm:$0xff]  }
 0x247   :  { %8059 = vst [vmem:[#allocation14_spill] sm:$0xff] %v7288_v9  ;;  %v7296_v54 = vpop.f32.mrb[62].mxu1  ;;  %v6301_v9 = vld [vmem:[%s8036_s3 + $0xd0] ss:$8 sps:$4 sm:$0xff]  }
 0x248   :  { %8060 = vst [vmem:[#allocation15_spill] sm:$0xff] %v7296_v54 }
 0x24a   :  { %5359 = vmatmul.mubr.msk.bf16.gmra.mrb[48].mxu0 %vm277_vm1, %v6274_v29  ;;  %v6292_v29 = vld [vmem:[%s8036_s3 + $0xa0] ss:$8 sps:$4 sm:$0xff]  }
 0x24b   :  { %2829 = vmatprep.mubr.bf16.mxu0 %v8044_v1  ;;  %3341 = vmatpush1.bf16.msra.mxu1 %v6292_v29  ;;  %v6295_v1 = vld [vmem:[%s8036_s3 + $0xb0] ss:$8 sps:$4 sm:$0xff]   ;;  %v6300_v29 = vld [vmem:[%s8036_s3 + $0xc4] ss:$8 sps:$4 sm:$0xff]  }
 0x24c   :  { %3342 = vmatprep.subr.bf16.mxu1 %v6297_v53  ;;  %v6303_v53 = vld [vmem:[%s8036_s3 + $0xd4] ss:$8 sps:$4 sm:$0xff]  }
 0x24f   :  { %3343 = vmatpush1.bf16.msra.mxu1 %v6295_v1  ;;  %v6298_v1 = vld [vmem:[%s8036_s3 + $0xc0] ss:$8 sps:$4 sm:$0xff]  }
 0x250   :  { %3344 = vmatprep.subr.bf16.mxu1 %v6300_v29 }
 0x252   :  { %5360 = vmatmul.mubr.msk.bf16.gmra.mrb[52].mxu0 %vm277_vm1, %v6275_v14  ;;  %v7301_v14 = vpop.f32.mrb[63].mxu1 }
 0x253   :  { %2839 = vmatprep.mubr.bf16.mxu0 %v8058_v4  ;;  %8061 = vst [vmem:[#allocation16_spill] sm:$0xff] %v7301_v14  ;;  %3345 = vmatpush1.bf16.msra.mxu1 %v6298_v1  ;;  %v7310_v54 = vpop.f32.mrb[64].mxu1  ;;  %v6306_v1 = vld [vmem:[%s8036_s3 + $0xe4] ss:$8 sps:$4 sm:$0xff]  }
 0x254   :  { %3346 = vmatprep.subr.bf16.mxu1 %v6303_v53  ;;  %8062 = vst [vmem:[#allocation17_spill] sm:$0xff] %v7310_v54  ;;  %v7313_v29 = vpop.f32.mrb[65].mxu1  ;;  %v6278_v54 = vld [vmem:[%s8035_s0 + $0xa0] sm:$0xff]  }
 0x255   :  { %8063 = vst [vmem:[#allocation18_spill] sm:$0xff] %v7313_v29  ;;  %v7318_v14 = vpop.f32.mrb[66].mxu1 }
 0x256   :  { %8064 = vst [vmem:[#allocation19_spill] sm:$0xff] %v7318_v14  ;;  %v7323_v53 = vpop.f32.mrb[67].mxu1  ;;  %v6307_v14 = vld [vmem:[%s8036_s3 + $0xf0] ss:$8 sps:$4 sm:$0xff]  }
 0x257   :  { %3347 = vmatpush1.bf16.msra.mxu1 %v6301_v9  ;;  %8065 = vst [vmem:[#allocation20_spill] sm:$0xff] %v7323_v53  ;;  %v6309_v9 = vld [vmem:[%s8036_s3 + $0xf4] ss:$8 sps:$4 sm:$0xff]  }
 0x258   :  { %3348 = vmatprep.subr.bf16.mxu1 %v6306_v1  ;;  %v7335_v1 = vpop.f32.mrb[68].mxu1 }
 0x259   :  { %8066 = vst [vmem:[#allocation21_spill] sm:$0xff] %v7335_v1  ;;  %v7338_v53 = vpop.f32.mrb[69].mxu1 }
 0x25a   :  { %5361 = vmatmul.mubr.msk.bf16.gmra.mrb[56].mxu0 %vm277_vm1, %v6276_v44  ;;  %v6277_v44 = vld [vmem:[%s8035_s0 + $0x98] sm:$0xff]   ;;  %8067 = vst [vmem:[#allocation22_spill] sm:$0xff] %v7338_v53  ;;  %v7340_v29 = vpop.f32.mrb[70].mxu1 }
 0x25b   :  { %2849 = vmatprep.mubr.bf16.mxu0 %v8058_v4  ;;  %3349 = vmatpush1.bf16.msra.mxu1 %v6304_v39  ;;  %8068 = vst [vmem:[#allocation23_spill] sm:$0xff] %v7340_v29  ;;  %v7342_v39 = vpop.f32.mrb[71].mxu1 }
 0x25c   :  { %3350 = vmatprep.subr.bf16.mxu1 %v6309_v9  ;;  %8069 = vst [vmem:[#allocation24_spill] sm:$0xff] %v7342_v39  ;;  %v7348_v9 = vpop.f32.mrb[72].mxu1  ;;  %v6279_v39 = vld [vmem:[%s8035_s0 + $0xa8] sm:$0xff]  }
 0x25d   :  { %8070 = vst [vmem:[#allocation25_spill] sm:$0xff] %v7348_v9 }
 0x25f   :  { %3351 = vmatpush1.bf16.msra.mxu1 %v6307_v14  ;;  %v7351_v14 = vpop.f32.mrb[73].mxu1 }
 0x260   :  { %8071 = vst [vmem:[#allocation26_spill] sm:$0xff] %v7351_v14 }
 0x262   :  { %5362 = vmatmul.mubr.msk.bf16.gmra.mrb[60].mxu0 %vm277_vm1, %v6277_v44  ;;  %v7353_v44 = vpop.f32.mrb[74].mxu1 }
 0x263   :  { %2859 = vmatprep.mubr.bf16.mxu0 %v8058_v4  ;;  %8072 = vst [vmem:[#allocation27_spill] sm:$0xff] %v7353_v44  ;;  %v7355_v1 = vpop.f32.mrb[75].mxu1 }
 0x264   :  { %8073 = vst [vmem:[#allocation28_spill] sm:$0xff] %v7355_v1  ;;  %v7361_v29 = vpop.f32.mrb[76].mxu1  ;;  %v6280_v1 = vld [vmem:[%s8035_s0 + $0xb0] sm:$0xff]  }
 0x265   :  { %8074 = vst [vmem:[#allocation29_spill] sm:$0xff] %v7361_v29 }
 0x26a   :  { %5363 = vmatmul.mubr.msk.bf16.gmra.mrb[64].mxu0 %vm277_vm1, %v6278_v54  ;;  %v7364_v54 = vpop.f32.mrb[77].mxu1 }
 0x26b   :  { %2869 = vmatprep.mubr.bf16.mxu0 %v8058_v4  ;;  %8075 = vst [vmem:[#allocation30_spill] sm:$0xff] %v7364_v54  ;;  %v7366_v9 = vpop.f32.mrb[78].mxu1 }
 0x26c   :  { %8076 = vst [vmem:[#allocation31_spill] sm:$0xff] %v7366_v9  ;;  %v7368_v53 = vpop.f32.mrb[79].mxu1 }
 0x26d   :  { %8077 = vst [vmem:[#allocation32_spill] sm:$0xff] %v7368_v53  ;;  %v7374_v44 = vpop.f32.mrb[80].mxu1  ;;  %v6281_v53 = vld [vmem:[%s8035_s0 + $0xb8] sm:$0xff]  }
 0x26e   :  { %8078 = vst [vmem:[#allocation33_spill] sm:$0xff] %v7374_v44 }
 0x272   :  { %5364 = vmatmul.mubr.msk.bf16.gmra.mrb[68].mxu0 %vm277_vm1, %v6279_v39  ;;  %v7377_v39 = vpop.f32.mrb[81].mxu1 }
 0x273   :  { %2879 = vmatprep.mubr.bf16.mxu0 %v8058_v4  ;;  %8079 = vst [vmem:[#allocation34_spill] sm:$0xff] %v7377_v39  ;;  %v7379_v29 = vpop.f32.mrb[82].mxu1 }
 0x274   :  { %8080 = vst [vmem:[#allocation35_spill] sm:$0xff] %v7379_v29  ;;  %v7381_v14 = vpop.f32.mrb[83].mxu1 }
 0x275   :  { %8081 = vst [vmem:[#allocation36_spill] sm:$0xff] %v7381_v14  ;;  %v7387_v9 = vpop.f32.mrb[84].mxu1  ;;  %v6282_v14 = vld [vmem:[%s8035_s0 + $0xc0] sm:$0xff]  }
 0x276   :  { %8082 = vst [vmem:[#allocation37_spill] sm:$0xff] %v7387_v9 }
 0x27a   :  { %5365 = vmatmul.mubr.msk.bf16.gmra.mrb[72].mxu0 %vm277_vm1, %v6280_v1  ;;  %v7390_v1 = vpop.f32.mrb[85].mxu1 }
 0x27b   :  { %2889 = vmatprep.mubr.bf16.mxu0 %v8058_v4  ;;  %8083 = vst [vmem:[#allocation38_spill] sm:$0xff] %v7390_v1  ;;  %v7392_v44 = vpop.f32.mrb[86].mxu1 }
 0x27c   :  { %8084 = vst [vmem:[#allocation39_spill] sm:$0xff] %v7392_v44  ;;  %v7394_v54 = vpop.f32.mrb[87].mxu1 }
 0x27d   :  { %8085 = vst [vmem:[#allocation40_spill] sm:$0xff] %v7394_v54  ;;  %v7400_v29 = vpop.f32.mrb[88].mxu1  ;;  %v6283_v54 = vld [vmem:[%s8035_s0 + $0xc8] sm:$0xff]  }
 0x27e   :  { %8086 = vst [vmem:[#allocation41_spill] sm:$0xff] %v7400_v29 }
 0x282   :  { %5366 = vmatmul.mubr.msk.bf16.gmra.mrb[76].mxu0 %vm277_vm1, %v6281_v53  ;;  %v7403_v53 = vpop.f32.mrb[89].mxu1 }
 0x283   :  { %2899 = vmatprep.mubr.bf16.mxu0 %v8058_v4  ;;  %8087 = vst [vmem:[#allocation42_spill] sm:$0xff] %v7403_v53  ;;  %v7405_v9 = vpop.f32.mrb[90].mxu1 }
 0x284   :  { %8088 = vst [vmem:[#allocation43_spill] sm:$0xff] %v7405_v9  ;;  %v7407_v39 = vpop.f32.mrb[91].mxu1 }
 0x285   :  { %8089 = vst [vmem:[#allocation44_spill] sm:$0xff] %v7407_v39  ;;  %v7413_v44 = vpop.f32.mrb[92].mxu1  ;;  %v6284_v39 = vld [vmem:[%s8035_s0 + $0xd0] sm:$0xff]  }
 0x286   :  { %8090 = vst [vmem:[#allocation45_spill] sm:$0xff] %v7413_v44 }
 0x28a   :  { %5367 = vmatmul.mubr.msk.bf16.gmra.mrb[80].mxu0 %vm277_vm1, %v6282_v14  ;;  %v7416_v14 = vpop.f32.mrb[93].mxu1 }
 0x28b   :  { %2909 = vmatprep.mubr.bf16.mxu0 %v8058_v4  ;;  %8091 = vst [vmem:[#allocation46_spill] sm:$0xff] %v7416_v14  ;;  %v7418_v29 = vpop.f32.mrb[94].mxu1 }
 0x28c   :  { %8092 = vst [vmem:[#allocation47_spill] sm:$0xff] %v7418_v29  ;;  %v7420_v1 = vpop.f32.mrb[95].mxu1  ;;  %v6312_v29 = vld [vmem:[%s8036_s3 + $0x4] ss:$8 sps:$4 sm:$0xff]  }
 0x28d   :  { %8093 = vst [vmem:[#allocation48_spill] sm:$0xff] %v7420_v1  ;;  %3529 = vmatprep.subr.bf16.mxu1 %v6312_v29 }
 0x292   :  { %5368 = vmatmul.mubr.msk.bf16.gmra.mrb[84].mxu0 %vm277_vm1, %v6283_v54  ;;  %v6285_v54 = vld [vmem:[%s8035_s0 + $0xd8] sm:$0xff]  }
 0x293   :  { %2919 = vmatprep.mubr.bf16.mxu0 %v8058_v4 }
 0x29a   :  { %5369 = vmatmul.mubr.msk.bf16.gmra.mrb[88].mxu0 %vm277_vm1, %v6284_v39 }
 0x29b   :  { %2929 = vmatprep.mubr.bf16.mxu0 %v8058_v4 }
 0x2a2   :  { %5370 = vmatmul.mubr.msk.bf16.gmra.mrb[92].mxu0 %vm277_vm1, %v6285_v54 }
 0x2bd   :  { %v2701_v1 = vpop.f32.mrb[0].mxu0 }
 0x2be   :  { %v5621_v14 = vadd.f32 %v2701_v1, %v7066_v58  ;;  %v2703_v44 = vpop.f32.mrb[1].mxu0 }
 0x2bf   :  { %v5622_v9 = vadd.f32 %v2703_v44, %v7069_v59  ;;  %v2705_v39 = vpop.f32.mrb[2].mxu0 }
 0x2c0   :  { %v5623_v53 = vadd.f32 %v2705_v39, %v7071_v60  ;;  %v2707_v34 = vpop.f32.mrb[3].mxu0 }
 0x2c1   :  { %v3036_v24 = vmax.f32 %v5621_v14, %v5622_v9  ;;  %v5624_v19 = vadd.f32 %v2707_v34, %v7073_v61 }
 0x2c3   :  { %v3037_v62 = vmax.f32 %v5623_v53, %v5624_v19  ;;  %v3091_v9 = vadd.f32 %v7441_v57, %v3036_v24 }
 0x2c5   :  { %v2711_v54 = vpop.f32.mrb[4].mxu0  ;;  %v3092_v19 = vadd.f32 %v7441_v57, %v3037_v62  ;;  %v3139_v39 = vmax.f32 %v3091_v9, 0.0 }
 0x2c6   :  { %v5625_v29 = vadd.f32 %v2711_v54, %v7079_v63  ;;  %v2713_v58 = vpop.f32.mrb[5].mxu0 }
 0x2c7   :  { %v5626_v1 = vadd.f32 %v2713_v58, %v7082_v0  ;;  %v2715_v59 = vpop.f32.mrb[6].mxu0 }
 0x2c8   :  { %v5627_v44 = vadd.f32 %v2715_v59, %v7084_v2  ;;  %v2717_v60 = vpop.f32.mrb[7].mxu0  ;;  %v3140_v2 = vmax.f32 %v3092_v19, 0.0 }
 0x2c9   :  { %v3038_v14 = vmax.f32 %v5625_v29, %v5626_v1  ;;  %v5628_v61 = vadd.f32 %v2717_v60, %v7086_v3 }
 0x2cb   :  { %v3093_v34 = vadd.f32 %v7441_v57, %v3038_v14  ;;  %v3039_v53 = vmax.f32 %v5627_v44, %v5628_v61 }
 0x2cd   :  { %v3141_v56 = vmax.f32 %v3093_v34, 0.0  ;;  %v3094_v63 = vadd.f32 %v7441_v57, %v3039_v53  ;;  %v2721_v54 = vpop.f32.mrb[8].mxu0 }
 0x2ce   :  { %v5629_v0 = vadd.f32 %v2721_v54, %v7092_v5  ;;  %v2723_v58 = vpop.f32.mrb[9].mxu0 }
 0x2cf   :  { %v7452_v59 = vmax.f32 %v3139_v39, %v3141_v56  ;;  %v3142_v24 = vmax.f32 %v3094_v63, 0.0  ;;  %v5630_v29 = vadd.f32 %v2723_v58, %v7095_v6  ;;  %v2725_v3 = vpop.f32.mrb[10].mxu0 }
 0x2d0   :  { %v5631_v62 = vadd.f32 %v2725_v3, %v7097_v7  ;;  %v2727_v1 = vpop.f32.mrb[11].mxu0 }
 0x2d1   :  { %v7456_v60 = vmax.f32 %v3140_v2, %v3142_v24  ;;  %v3040_v44 = vmax.f32 %v5629_v0, %v5630_v29  ;;  %v5632_v9 = vadd.f32 %v2727_v1, %v7099_v8 }
 0x2d3   :  { %v3211_v14 = vpack.c.bf16 %v7456_v60, %v7452_v59  ;;  %v3041_v5 = vmax.f32 %v5631_v62, %v5632_v9  ;;  %v3095_v39 = vadd.f32 %v7441_v57, %v3040_v44  ;;  %v6342_v59 = vld [vmem:[%s8036_s3 + $0x124] ss:$8 sps:$4 sm:$0xff]  }
 0x2d5   :  { %v2731_v61 = vpop.f32.mrb[12].mxu0  ;;  %v3096_v8 = vadd.f32 %v7441_v57, %v3041_v5  ;;  %v3143_v2 = vmax.f32 %v3095_v39, 0.0 }
 0x2d6   :  { %v5633_v56 = vadd.f32 %v2731_v61, %v7105_v10  ;;  %v2733_v19 = vpop.f32.mrb[13].mxu0 }
 0x2d7   :  { %v5634_v34 = vadd.f32 %v2733_v19, %v7108_v11  ;;  %v2735_v6 = vpop.f32.mrb[14].mxu0 }
 0x2d8   :  { %v5635_v53 = vadd.f32 %v2735_v6, %v7110_v12  ;;  %v2737_v7 = vpop.f32.mrb[15].mxu0  ;;  %v3144_v12 = vmax.f32 %v3096_v8, 0.0 }
 0x2d9   :  { %v3042_v63 = vmax.f32 %v5633_v56, %v5634_v34  ;;  %v5636_v54 = vadd.f32 %v2737_v7, %v7112_v13  ;;  %v6310_v34 = vld [vmem:[%s8036_s3] ss:$8 sps:$4 sm:$0xff]  }
 0x2db   :  { %v3097_v0 = vadd.f32 %v7441_v57, %v3042_v63  ;;  %v3043_v58 = vmax.f32 %v5635_v53, %v5636_v54  ;;  %v6315_v53 = vld [vmem:[%s8036_s3 + $0x14] ss:$8 sps:$4 sm:$0xff]   ;;  %v6318_v54 = vld [vmem:[%s8036_s3 + $0x24] ss:$8 sps:$4 sm:$0xff]  }
 0x2dd   :  { %v3145_v24 = vmax.f32 %v3097_v0, 0.0  ;;  %v3098_v10 = vadd.f32 %v7441_v57, %v3043_v58  ;;  %v2741_v29 = vpop.f32.mrb[16].mxu0 }
 0x2de   :  { %v5637_v11 = vadd.f32 %v2741_v29, %v7118_v15  ;;  %v2743_v3 = vpop.f32.mrb[17].mxu0 }
 0x2df   :  { %v3189_v62 = vmax.f32 %v3143_v2, %v3145_v24  ;;  %v3146_v1 = vmax.f32 %v3098_v10, 0.0  ;;  %v5638_v44 = vadd.f32 %v2743_v3, %v7121_v16  ;;  %v2745_v9 = vpop.f32.mrb[18].mxu0  ;;  %v6316_v24 = vld [vmem:[%s8036_s3 + $0x20] ss:$8 sps:$4 sm:$0xff]  }
 0x2e0   :  { %v5639_v13 = vadd.f32 %v2745_v9, %v7123_v17  ;;  %v2747_v5 = vpop.f32.mrb[19].mxu0 }
 0x2e1   :  { %v3190_v61 = vmax.f32 %v3144_v12, %v3146_v1  ;;  %v3044_v56 = vmax.f32 %v5637_v11, %v5638_v44  ;;  %v5640_v19 = vadd.f32 %v2747_v5, %v7125_v18  ;;  %v6313_v18 = vld [vmem:[%s8036_s3 + $0x10] ss:$8 sps:$4 sm:$0xff]  }
 0x2e2   :  { %v6319_v44 = vld [vmem:[%s8036_s3 + $0x30] ss:$8 sps:$4 sm:$0xff]  }
 0x2e3   :  { %v7476_v6 = vpack.c.bf16 %v3190_v61, %v3189_v62  ;;  %v3045_v15 = vmax.f32 %v5639_v13, %v5640_v19  ;;  %v6324_v19 = vld [vmem:[%s8036_s3 + $0x44] ss:$8 sps:$4 sm:$0xff]  }
 0x2e5   :  { %v2751_v16 = vpop.f32.mrb[20].mxu0  ;;  %3369 = vmatmul.mubr.bf16.vlgmr.msra.gmra.mrb[96].mxu1 %v7476_v6 }
 0x2e6   :  { %v5641_v17 = vadd.f32 %v2751_v16, %v7131_v20  ;;  %v2753_v7 = vpop.f32.mrb[21].mxu0  ;;  %3378 = vmatprep.mubr.bf16.mxu1 %v8058_v4  ;;  %3530 = vmatpush1.bf16.msra.mxu1 %v6310_v34  ;;  %v3099_v20 = vadd.f32 %v7441_v57, %v3044_v56 }
 0x2e7   :  { %v5642_v39 = vadd.f32 %v2753_v7, %v7134_v21  ;;  %v2755_v63 = vpop.f32.mrb[22].mxu0  ;;  %3531 = vmatprep.subr.bf16.mxu1 %v6315_v53  ;;  %v3100_v21 = vadd.f32 %v7441_v57, %v3045_v15 }
 0x2e8   :  { %v5643_v8 = vadd.f32 %v2755_v63, %v7136_v22  ;;  %v2757_v0 = vpop.f32.mrb[23].mxu0  ;;  %v6321_v22 = vld [vmem:[%s8036_s3 + $0x34] ss:$8 sps:$4 sm:$0xff]   ;;  %v3147_v11 = vmax.f32 %v3099_v20, 0.0  ;;  %v6325_v63 = vld [vmem:[%s8036_s3 + $0x50] ss:$8 sps:$4 sm:$0xff]  }
 0x2e9   :  { %v3046_v58 = vmax.f32 %v5641_v17, %v5642_v39  ;;  %v5644_v2 = vadd.f32 %v2757_v0, %v7138_v23  ;;  %v3148_v9 = vmax.f32 %v3100_v21, 0.0  ;;  %v6322_v17 = vld [vmem:[%s8036_s3 + $0x40] ss:$8 sps:$4 sm:$0xff]   ;;  %v6330_v0 = vld [vmem:[%s8036_s3 + $0x64] ss:$8 sps:$4 sm:$0xff]  }
 0x2ea   :  { %3532 = vmatpush1.bf16.msra.mxu1 %v6313_v18  ;;  %v6327_v18 = vld [vmem:[%s8036_s3 + $0x54] ss:$8 sps:$4 sm:$0xff]   ;;  %v6328_v21 = vld [vmem:[%s8036_s3 + $0x60] ss:$8 sps:$4 sm:$0xff]  }
 0x2eb   :  { %v3101_v10 = vadd.f32 %v7441_v57, %v3046_v58  ;;  %v3047_v29 = vmax.f32 %v5643_v8, %v5644_v2  ;;  %3533 = vmatprep.subr.bf16.mxu1 %v6318_v54 }
 0x2ed   :  { %v3149_v3 = vmax.f32 %v3101_v10, 0.0  ;;  %v3102_v12 = vadd.f32 %v7441_v57, %v3047_v29  ;;  %v2761_v23 = vpop.f32.mrb[24].mxu0 }
 0x2ee   :  { %v5645_v62 = vadd.f32 %v2761_v23, %v7144_v25  ;;  %v2763_v1 = vpop.f32.mrb[25].mxu0  ;;  %3534 = vmatpush1.bf16.msra.mxu1 %v6316_v24 }
 0x2ef   :  { %v3150_v13 = vmax.f32 %v3102_v12, 0.0  ;;  %v5646_v5 = vadd.f32 %v2763_v1, %v7147_v26  ;;  %v2765_v61 = vpop.f32.mrb[26].mxu0  ;;  %v3191_v56 = vmax.f32 %v3147_v11, %v3149_v3  ;;  %3535 = vmatprep.subr.bf16.mxu1 %v6321_v22 }
 0x2f0   :  { %v5647_v34 = vadd.f32 %v2765_v61, %v7149_v27  ;;  %v2767_v25 = vpop.f32.mrb[27].mxu0  ;;  %v6336_v61 = vld [vmem:[%s8036_s3 + $0x104] ss:$8 sps:$4 sm:$0xff]  }
 0x2f1   :  { %v3048_v15 = vmax.f32 %v5645_v62, %v5646_v5  ;;  %v5648_v53 = vadd.f32 %v2767_v25, %v7151_v28  ;;  %v3192_v16 = vmax.f32 %v3148_v9, %v3150_v13  ;;  %v6331_v62 = vld [vmem:[%s8036_s3 + $0x70] ss:$8 sps:$4 sm:$0xff]  }
 0x2f2   :  { %3536 = vmatpush1.bf16.msra.mxu1 %v6319_v44 }
 0x2f3   :  { %v3049_v26 = vmax.f32 %v5647_v34, %v5648_v53  ;;  %v7516_v7 = vpack.c.bf16 %v3192_v16, %v3191_v56  ;;  %3537 = vmatprep.subr.bf16.mxu1 %v6324_v19 }
 0x2f5   :  { %v2771_v39 = vpop.f32.mrb[28].mxu0  ;;  %3379 = vmatmul.mubr.bf16.gmra.mrb[100].mxu1 %v7516_v7 }
 0x2f6   :  { %v5649_v27 = vadd.f32 %v2771_v39, %v7157_v30  ;;  %v2773_v28 = vpop.f32.mrb[29].mxu0  ;;  %3388 = vmatprep.mubr.bf16.mxu1 %v8058_v4  ;;  %3538 = vmatpush1.bf16.msra.mxu1 %v6322_v17  ;;  %v3103_v30 = vadd.f32 %v7441_v57, %v3048_v15 }
 0x2f7   :  { %v5650_v54 = vadd.f32 %v2773_v28, %v7160_v31  ;;  %v2775_v8 = vpop.f32.mrb[30].mxu0  ;;  %3539 = vmatprep.subr.bf16.mxu1 %v6327_v18  ;;  %v3104_v31 = vadd.f32 %v7441_v57, %v3049_v26 }
 0x2f8   :  { %v5651_v20 = vadd.f32 %v2775_v8, %v7162_v32  ;;  %v2777_v58 = vpop.f32.mrb[31].mxu0  ;;  %v6333_v32 = vld [vmem:[%s8036_s3 + $0x74] ss:$8 sps:$4 sm:$0xff]   ;;  %v3151_v22 = vmax.f32 %v3103_v30, 0.0 }
 0x2f9   :  { %v3050_v2 = vmax.f32 %v5649_v27, %v5650_v54  ;;  %v5652_v24 = vadd.f32 %v2777_v58, %v7164_v33  ;;  %v3152_v1 = vmax.f32 %v3104_v31, 0.0 }
 0x2fa   :  { %3540 = vmatpush1.bf16.msra.mxu1 %v6325_v63 }
 0x2fb   :  { %v3105_v10 = vadd.f32 %v7441_v57, %v3050_v2  ;;  %v3051_v29 = vmax.f32 %v5651_v20, %v5652_v24  ;;  %3541 = vmatprep.subr.bf16.mxu1 %v6330_v0 }
 0x2fd   :  { %v3153_v11 = vmax.f32 %v3105_v10, 0.0  ;;  %v3106_v3 = vadd.f32 %v7441_v57, %v3051_v29  ;;  %v2781_v33 = vpop.f32.mrb[32].mxu0 }
 0x2fe   :  { %v5653_v12 = vadd.f32 %v2781_v33, %v7170_v35  ;;  %v2783_v23 = vpop.f32.mrb[33].mxu0  ;;  %3542 = vmatpush1.bf16.msra.mxu1 %v6328_v21 }
 0x2ff   :  { %v3193_v44 = vmax.f32 %v3151_v22, %v3153_v11  ;;  %v3154_v9 = vmax.f32 %v3106_v3, 0.0  ;;  %v5654_v13 = vadd.f32 %v2783_v23, %v7173_v36  ;;  %v2785_v5 = vpop.f32.mrb[34].mxu0  ;;  %3543 = vmatprep.subr.bf16.mxu1 %v6333_v32 }
 0x300   :  { %v5655_v56 = vadd.f32 %v2785_v5, %v7175_v37  ;;  %v2787_v35 = vpop.f32.mrb[35].mxu0 }
 0x301   :  { %v3194_v19 = vmax.f32 %v3152_v1, %v3154_v9  ;;  %v3052_v34 = vmax.f32 %v5653_v12, %v5654_v13  ;;  %v5656_v25 = vadd.f32 %v2787_v35, %v7177_v38 }
 0x302   :  { %3544 = vmatpush1.bf16.msra.mxu1 %v6331_v62 }
 0x303   :  { %v3053_v15 = vmax.f32 %v5655_v56, %v5656_v25  ;;  %v7553_v53 = vpack.c.bf16 %v3194_v19, %v3193_v44  ;;  %3739 = vmatprep.subr.bf16.mxu1 %v6336_v61  ;;  %v3107_v38 = vadd.f32 %v7441_v57, %v3052_v34 }
 0x305   :  { %v2791_v16 = vpop.f32.mrb[36].mxu0  ;;  %3389 = vmatmul.mubr.bf16.gmra.mrb[104].mxu1 %v7553_v53  ;;  %v3108_v63 = vadd.f32 %v7441_v57, %v3053_v15  ;;  %v8094_v15 = vld [vmem:[#allocation2_spill] sm:$0xff] }
 0x306   :  { %v5657_v36 = vadd.f32 %v2791_v16, %v7183_v40  ;;  %v2793_v17 = vpop.f32.mrb[37].mxu0  ;;  %3398 = vmatprep.mubr.bf16.mxu1 %v8058_v4  ;;  %v3155_v40 = vmax.f32 %v3107_v38, 0.0 }
 0x307   :  { %v5658_v37 = vadd.f32 %v2793_v17, %v7186_v41  ;;  %v2795_v26 = vpop.f32.mrb[38].mxu0 }
 0x308   :  { %v5659_v18 = vadd.f32 %v2795_v26, %v7188_v42  ;;  %v2797_v39 = vpop.f32.mrb[39].mxu0  ;;  %v3156_v42 = vmax.f32 %v3108_v63, 0.0 }
 0x309   :  { %v3054_v27 = vmax.f32 %v5657_v36, %v5658_v37  ;;  %v5660_v28 = vadd.f32 %v2797_v39, %v7190_v43  ;;  %v8096_v39 = vld [vmem:[#allocation4_spill] sm:$0xff] }
 0x30b   :  { %v3109_v54 = vadd.f32 %v7441_v57, %v3054_v27  ;;  %v3055_v8 = vmax.f32 %v5659_v18, %v5660_v28 }
 0x30d   :  { %v3157_v0 = vmax.f32 %v3109_v54, 0.0  ;;  %v3110_v20 = vadd.f32 %v7441_v57, %v3055_v8  ;;  %v2801_v58 = vpop.f32.mrb[40].mxu0 }
 0x30e   :  { %v5661_v41 = vadd.f32 %v2801_v58, %v7195_v45  ;;  %v2803_v30 = vpop.f32.mrb[41].mxu0  ;;  %v8099_v58 = vld [vmem:[#allocation7_spill] sm:$0xff] }
 0x30f   :  { %v3195_v2 = vmax.f32 %v3155_v40, %v3157_v0  ;;  %v3158_v24 = vmax.f32 %v3110_v20, 0.0  ;;  %v5662_v21 = vadd.f32 %v2803_v30, %v7197_v46  ;;  %v2805_v31 = vpop.f32.mrb[42].mxu0  ;;  %v8098_v40 = vld [vmem:[#allocation6_spill] sm:$0xff] }
 0x310   :  { %v5663_v43 = vadd.f32 %v2805_v31, %v7199_v47  ;;  %v2807_v10 = vpop.f32.mrb[43].mxu0 }
 0x311   :  { %v3196_v29 = vmax.f32 %v3156_v42, %v3158_v24  ;;  %v3056_v32 = vmax.f32 %v5661_v41, %v5662_v21  ;;  %v5664_v22 = vadd.f32 %v2807_v10, %v7201_v48  ;;  %v8100_v24 = vld [vmem:[#allocation8_spill] sm:$0xff] }
 0x313   :  { %v7569_v11 = vpack.c.bf16 %v3196_v29, %v3195_v2  ;;  %v3057_v3 = vmax.f32 %v5663_v43, %v5664_v22  ;;  %v3111_v1 = vadd.f32 %v7441_v57, %v3056_v32 }
 0x315   :  { %v2811_v33 = vpop.f32.mrb[44].mxu0  ;;  %3399 = vmatmul.mubr.bf16.gmra.mrb[108].mxu1 %v7569_v11  ;;  %v3112_v9 = vadd.f32 %v7441_v57, %v3057_v3 }
 0x316   :  { %v5665_v45 = vadd.f32 %v2811_v33, %v7204_v49  ;;  %v2813_v12 = vpop.f32.mrb[45].mxu0  ;;  %3408 = vmatprep.mubr.bf16.mxu1 %v8058_v4  ;;  %v3159_v49 = vmax.f32 %v3111_v1, 0.0  ;;  %v8101_v33 = vld [vmem:[#allocation9_spill] sm:$0xff] }
 0x317   :  { %v5666_v46 = vadd.f32 %v2813_v12, %v7207_v50  ;;  %v2815_v23 = vpop.f32.mrb[46].mxu0 }
 0x318   :  { %v5667_v47 = vadd.f32 %v2815_v23, %v7209_v51  ;;  %v2817_v62 = vpop.f32.mrb[47].mxu0  ;;  %v3160_v51 = vmax.f32 %v3112_v9, 0.0 }
 0x319   :  { %v3058_v48 = vmax.f32 %v5665_v45, %v5666_v46  ;;  %v5668_v44 = vadd.f32 %v2817_v62, %v7211_v52  ;;  %v8095_v52 = vld [vmem:[#allocation3_spill] sm:$0xff]  ;;  %v8102_v62 = vld [vmem:[#allocation10_spill] sm:$0xff] }
 0x31b   :  { %v3113_v13 = vadd.f32 %v7441_v57, %v3058_v48  ;;  %v3059_v5 = vmax.f32 %v5667_v47, %v5668_v44  ;;  %v8103_v44 = vld [vmem:[#allocation11_spill] sm:$0xff] }
 0x31d   :  { %v3161_v61 = vmax.f32 %v3113_v13, 0.0  ;;  %v3114_v56 = vadd.f32 %v7441_v57, %v3059_v5  ;;  %v2821_v35 = vpop.f32.mrb[48].mxu0 }
 0x31e   :  { %v5669_v50 = vadd.f32 %v2821_v35, %v7222_v55  ;;  %v2823_v19 = vpop.f32.mrb[49].mxu0  ;;  %v8097_v55 = vld [vmem:[#allocation5_spill] sm:$0xff] }
 0x31f   :  { %v3197_v34 = vmax.f32 %v3159_v49, %v3161_v61  ;;  %v3162_v25 = vmax.f32 %v3114_v56, 0.0  ;;  %v5670_v16 = vadd.f32 %v2823_v19, %v8094_v15  ;;  %v2825_v36 = vpop.f32.mrb[50].mxu0  ;;  %v8104_v61 = vld [vmem:[#allocation12_spill] sm:$0xff]  ;;  %v8106_v15 = vld [vmem:[#allocation14_spill] sm:$0xff] }
 0x320   :  { %v5671_v17 = vadd.f32 %v2825_v36, %v8095_v52  ;;  %v2827_v37 = vpop.f32.mrb[51].mxu0  ;;  %v8107_v52 = vld [vmem:[#allocation15_spill] sm:$0xff] }
 0x321   :  { %v3198_v26 = vmax.f32 %v3160_v51, %v3162_v25  ;;  %v3060_v18 = vmax.f32 %v5669_v50, %v5670_v16  ;;  %v5672_v38 = vadd.f32 %v2827_v37, %v8096_v39  ;;  %v8105_v51 = vld [vmem:[#allocation13_spill] sm:$0xff]  ;;  %v8108_v39 = vld [vmem:[#allocation16_spill] sm:$0xff] }
 0x323   :  { %v7585_v27 = vpack.c.bf16 %v3198_v26, %v3197_v34  ;;  %v3061_v28 = vmax.f32 %v5671_v17, %v5672_v38  ;;  %v3115_v42 = vadd.f32 %v7441_v57, %v3060_v18 }
 0x325   :  { %v2831_v63 = vpop.f32.mrb[52].mxu0  ;;  %3409 = vmatmul.mubr.bf16.gmra.mrb[112].mxu1 %v7585_v27  ;;  %v3116_v31 = vadd.f32 %v7441_v57, %v3061_v28  ;;  %v3163_v29 = vmax.f32 %v3115_v42, 0.0 }
 0x326   :  { %v5673_v54 = vadd.f32 %v2831_v63, %v8097_v55  ;;  %v2833_v8 = vpop.f32.mrb[53].mxu0  ;;  %3418 = vmatprep.mubr.bf16.mxu1 %v8058_v4 }
 0x327   :  { %v5674_v0 = vadd.f32 %v2833_v8, %v8098_v40  ;;  %v2835_v20 = vpop.f32.mrb[54].mxu0  ;;  %v3164_v46 = vmax.f32 %v3116_v31, 0.0 }
 0x328   :  { %v5675_v41 = vadd.f32 %v2835_v20, %v8099_v58  ;;  %v2837_v30 = vpop.f32.mrb[55].mxu0  ;;  %v8109_v20 = vld [vmem:[#allocation17_spill] sm:$0xff] }
 0x329   :  { %v3062_v2 = vmax.f32 %v5673_v54, %v5674_v0  ;;  %v5676_v21 = vadd.f32 %v2837_v30, %v8100_v24  ;;  %v8110_v24 = vld [vmem:[#allocation18_spill] sm:$0xff] }
 0x32b   :  { %v3117_v43 = vadd.f32 %v7441_v57, %v3062_v2  ;;  %v3063_v10 = vmax.f32 %v5675_v41, %v5676_v21 }
 0x32d   :  { %v3165_v32 = vmax.f32 %v3117_v43, 0.0  ;;  %v3118_v22 = vadd.f32 %v7441_v57, %v3063_v10  ;;  %v2841_v3 = vpop.f32.mrb[56].mxu0  ;;  %v8111_v43 = vld [vmem:[#allocation19_spill] sm:$0xff] }
 0x32e   :  { %v5677_v45 = vadd.f32 %v2841_v3, %v8101_v33  ;;  %v2843_v12 = vpop.f32.mrb[57].mxu0  ;;  %v8112_v3 = vld [vmem:[#allocation20_spill] sm:$0xff] }
 0x32f   :  { %v3199_v23 = vmax.f32 %v3163_v29, %v3165_v32  ;;  %v3166_v47 = vmax.f32 %v3118_v22, 0.0  ;;  %v5678_v1 = vadd.f32 %v2843_v12, %v8102_v62  ;;  %v2845_v48 = vpop.f32.mrb[58].mxu0 }
 0x330   :  { %v5679_v9 = vadd.f32 %v2845_v48, %v8103_v44  ;;  %v2847_v13 = vpop.f32.mrb[59].mxu0 }
 0x331   :  { %v3200_v5 = vmax.f32 %v3164_v46, %v3166_v47  ;;  %v3064_v49 = vmax.f32 %v5677_v45, %v5678_v1  ;;  %v5680_v56 = vadd.f32 %v2847_v13, %v8104_v61  ;;  %v8114_v1 = vld [vmem:[#allocation22_spill] sm:$0xff] }
 0x333   :  { %v7601_v35 = vpack.c.bf16 %v3200_v5, %v3199_v23  ;;  %v3065_v50 = vmax.f32 %v5679_v9, %v5680_v56  ;;  %v3119_v26 = vadd.f32 %v7441_v57, %v3064_v49  ;;  %v8113_v23 = vld [vmem:[#allocation21_spill] sm:$0xff]  ;;  %v8115_v9 = vld [vmem:[#allocation23_spill] sm:$0xff]  ;;  %v8116_v56 = vld [vmem:[#allocation24_spill] sm:$0xff] }
 0x335   :  { %v2851_v19 = vpop.f32.mrb[60].mxu0  ;;  %3419 = vmatmul.mubr.bf16.gmra.mrb[116].mxu1 %v7601_v35  ;;  %v3120_v28 = vadd.f32 %v7441_v57, %v3065_v50  ;;  %v3167_v54 = vmax.f32 %v3119_v26, 0.0 }
 0x336   :  { %v5681_v34 = vadd.f32 %v2851_v19, %v8105_v51  ;;  %v2853_v25 = vpop.f32.mrb[61].mxu0  ;;  %3428 = vmatprep.mubr.bf16.mxu1 %v8058_v4 }
 0x337   :  { %v5682_v16 = vadd.f32 %v2853_v25, %v8106_v15  ;;  %v2855_v36 = vpop.f32.mrb[62].mxu0  ;;  %v3168_v30 = vmax.f32 %v3120_v28, 0.0 }
 0x338   :  { %v5683_v17 = vadd.f32 %v2855_v36, %v8107_v52  ;;  %v2857_v37 = vpop.f32.mrb[63].mxu0  ;;  %v8117_v52 = vld [vmem:[#allocation25_spill] sm:$0xff] }
 0x339   :  { %v3066_v18 = vmax.f32 %v5681_v34, %v5682_v16  ;;  %v5684_v38 = vadd.f32 %v2857_v37, %v8108_v39 }
 0x33b   :  { %v3121_v63 = vadd.f32 %v7441_v57, %v3066_v18  ;;  %v3067_v55 = vmax.f32 %v5683_v17, %v5684_v38  ;;  %v8118_v38 = vld [vmem:[#allocation26_spill] sm:$0xff] }
 0x33d   :  { %v3169_v8 = vmax.f32 %v3121_v63, 0.0  ;;  %v3122_v40 = vadd.f32 %v7441_v57, %v3067_v55  ;;  %v2861_v0 = vpop.f32.mrb[64].mxu0  ;;  %v8119_v55 = vld [vmem:[#allocation27_spill] sm:$0xff] }
 0x33e   :  { %v5685_v58 = vadd.f32 %v2861_v0, %v8109_v20  ;;  %v2863_v41 = vpop.f32.mrb[65].mxu0  ;;  %v8120_v20 = vld [vmem:[#allocation28_spill] sm:$0xff] }
 0x33f   :  { %v3201_v42 = vmax.f32 %v3167_v54, %v3169_v8  ;;  %v3170_v2 = vmax.f32 %v3122_v40, 0.0  ;;  %v5686_v21 = vadd.f32 %v2863_v41, %v8110_v24  ;;  %v2865_v31 = vpop.f32.mrb[66].mxu0 }
 0x340   :  { %v5687_v10 = vadd.f32 %v2865_v31, %v8111_v43  ;;  %v2867_v29 = vpop.f32.mrb[67].mxu0  ;;  %v8122_v31 = vld [vmem:[#allocation30_spill] sm:$0xff] }
 0x341   :  { %v3202_v32 = vmax.f32 %v3168_v30, %v3170_v2  ;;  %v3068_v22 = vmax.f32 %v5685_v58, %v5686_v21  ;;  %v5688_v33 = vadd.f32 %v2867_v29, %v8112_v3  ;;  %v8121_v2 = vld [vmem:[#allocation29_spill] sm:$0xff]  ;;  %v8123_v29 = vld [vmem:[#allocation31_spill] sm:$0xff] }
 0x343   :  { %v7617_v45 = vpack.c.bf16 %v3202_v32, %v3201_v42  ;;  %v3069_v12 = vmax.f32 %v5687_v10, %v5688_v33  ;;  %v3123_v49 = vadd.f32 %v7441_v57, %v3068_v22 }
 0x345   :  { %v2871_v46 = vpop.f32.mrb[68].mxu0  ;;  %3429 = vmatmul.mubr.bf16.gmra.mrb[120].mxu1 %v7617_v45  ;;  %v3124_v19 = vadd.f32 %v7441_v57, %v3069_v12  ;;  %v3171_v25 = vmax.f32 %v3123_v49, 0.0  ;;  %v8124_v12 = vld [vmem:[#allocation32_spill] sm:$0xff]  ;;  %v8125_v49 = vld [vmem:[#allocation33_spill] sm:$0xff] }
 0x346   :  { %v5689_v47 = vadd.f32 %v2871_v46, %v8113_v23  ;;  %v2873_v62 = vpop.f32.mrb[69].mxu0  ;;  %3438 = vmatprep.mubr.bf16.mxu1 %v8058_v4  ;;  %v6334_v23 = vld [vmem:[%s8036_s3 + $0x100] ss:$8 sps:$4 sm:$0xff]  }
 0x347   :  { %v5690_v48 = vadd.f32 %v2873_v62, %v8114_v1  ;;  %v2875_v44 = vpop.f32.mrb[70].mxu0  ;;  %v3172_v26 = vmax.f32 %v3124_v19, 0.0 }
 0x348   :  { %v5691_v13 = vadd.f32 %v2875_v44, %v8115_v9  ;;  %v2877_v5 = vpop.f32.mrb[71].mxu0 }
 0x349   :  { %v3070_v61 = vmax.f32 %v5689_v47, %v5690_v48  ;;  %v5692_v50 = vadd.f32 %v2877_v5, %v8116_v56  ;;  %v6339_v48 = vld [vmem:[%s8036_s3 + $0x114] ss:$8 sps:$4 sm:$0xff]  }
 0x34b   :  { %v3125_v51 = vadd.f32 %v7441_v57, %v3070_v61  ;;  %v3071_v34 = vmax.f32 %v5691_v13, %v5692_v50  ;;  %v6337_v50 = vld [vmem:[%s8036_s3 + $0x110] ss:$8 sps:$4 sm:$0xff]  }
 0x34d   :  { %v3173_v15 = vmax.f32 %v3125_v51, 0.0  ;;  %v3126_v16 = vadd.f32 %v7441_v57, %v3071_v34  ;;  %v2881_v36 = vpop.f32.mrb[72].mxu0  ;;  %v8126_v34 = vld [vmem:[#allocation34_spill] sm:$0xff] }
 0x34e   :  { %v5693_v17 = vadd.f32 %v2881_v36, %v8117_v52  ;;  %v2883_v37 = vpop.f32.mrb[73].mxu0 }
 0x34f   :  { %v3203_v18 = vmax.f32 %v3171_v25, %v3173_v15  ;;  %v3174_v39 = vmax.f32 %v3126_v16, 0.0  ;;  %v5694_v28 = vadd.f32 %v2883_v37, %v8118_v38  ;;  %v2885_v63 = vpop.f32.mrb[74].mxu0  ;;  %v6345_v38 = vld [vmem:[%s8036_s3 + $0x134] ss:$8 sps:$4 sm:$0xff]  }
 0x350   :  { %v5695_v54 = vadd.f32 %v2885_v63, %v8119_v55  ;;  %v2887_v8 = vpop.f32.mrb[75].mxu0  ;;  %v8129_v55 = vld [vmem:[#allocation37_spill] sm:$0xff] }
 0x351   :  { %v3204_v40 = vmax.f32 %v3172_v26, %v3174_v39  ;;  %v3072_v0 = vmax.f32 %v5693_v17, %v5694_v28  ;;  %v5696_v58 = vadd.f32 %v2887_v8, %v8120_v20  ;;  %v8128_v17 = vld [vmem:[#allocation36_spill] sm:$0xff] }
 0x353   :  { %v3073_v41 = vmax.f32 %v5695_v54, %v5696_v58  ;;  %v7633_v30 = vpack.c.bf16 %v3204_v40, %v3203_v18  ;;  %v3127_v3 = vadd.f32 %v7441_v57, %v3072_v0  ;;  %v6340_v18 = vld [vmem:[%s8036_s3 + $0x120] ss:$8 sps:$4 sm:$0xff]   ;;  %v6343_v40 = vld [vmem:[%s8036_s3 + $0x130] ss:$8 sps:$4 sm:$0xff]  }
 0x354   :  { %v8130_v0 = vld [vmem:[#allocation38_spill] sm:$0xff] }
 0x355   :  { %v2891_v42 = vpop.f32.mrb[76].mxu0  ;;  %3439 = vmatmul.mubr.bf16.gmra.mrb[124].mxu1 %v7633_v30  ;;  %v3128_v47 = vadd.f32 %v7441_v57, %v3073_v41  ;;  %v3175_v44 = vmax.f32 %v3127_v3, 0.0  ;;  %v6348_v41 = vld [vmem:[%s8036_s3 + $0x144] ss:$8 sps:$4 sm:$0xff]   ;;  %v6351_v3 = vld [vmem:[%s8036_s3 + $0x154] ss:$8 sps:$4 sm:$0xff]  }
 0x356   :  { %v5697_v24 = vadd.f32 %v2891_v42, %v8121_v2  ;;  %v2893_v21 = vpop.f32.mrb[77].mxu0  ;;  %3561 = vmatprep.mubr.bf16.mxu1 %v8058_v4  ;;  %v8131_v42 = vld [vmem:[#allocation39_spill] sm:$0xff] }
 0x357   :  { %v5698_v43 = vadd.f32 %v2893_v21, %v8122_v31  ;;  %v2895_v10 = vpop.f32.mrb[78].mxu0  ;;  %v3176_v19 = vmax.f32 %v3128_v47, 0.0  ;;  %v8132_v31 = vld [vmem:[#allocation40_spill] sm:$0xff]  ;;  %v8133_v47 = vld [vmem:[#allocation41_spill] sm:$0xff] }
 0x358   :  { %v5699_v32 = vadd.f32 %v2895_v10, %v8123_v29  ;;  %v2897_v22 = vpop.f32.mrb[79].mxu0  ;;  %v6346_v10 = vld [vmem:[%s8036_s3 + $0x140] ss:$8 sps:$4 sm:$0xff]  }
 0x359   :  { %v3074_v33 = vmax.f32 %v5697_v24, %v5698_v43  ;;  %v5700_v46 = vadd.f32 %v2897_v22, %v8124_v12 }
 0x35b   :  { %v3129_v62 = vadd.f32 %v7441_v57, %v3074_v33  ;;  %v3075_v1 = vmax.f32 %v5699_v32, %v5700_v46 }
 0x35d   :  { %v3177_v9 = vmax.f32 %v3129_v62, 0.0  ;;  %v3130_v13 = vadd.f32 %v7441_v57, %v3075_v1  ;;  %v2901_v5 = vpop.f32.mrb[80].mxu0  ;;  %3562 = vmatmul.mubr.bf16.vlgmr.msra.gmra.mrb[96].mxu1 %v3211_v14  ;;  %v8127_v14 = vld [vmem:[#allocation35_spill] sm:$0xff] }
 0x35e   :  { %v5701_v61 = vadd.f32 %v2901_v5, %v8125_v49  ;;  %v2903_v56 = vpop.f32.mrb[81].mxu0  ;;  %3740 = vmatpush1.bf16.msra.mxu1 %v6334_v23  ;;  %3571 = vmatprep.mubr.bf16.mxu1 %v8058_v4 }
 0x35f   :  { %v3178_v51 = vmax.f32 %v3130_v13, 0.0  ;;  %v5702_v25 = vadd.f32 %v2903_v56, %v8126_v34  ;;  %v2905_v15 = vpop.f32.mrb[82].mxu0  ;;  %3741 = vmatprep.subr.bf16.mxu1 %v6339_v48  ;;  %v3205_v60 = vmax.f32 %v3175_v44, %v3177_v9  ;;  %v6349_v48 = vld [vmem:[%s8036_s3 + $0x150] ss:$8 sps:$4 sm:$0xff]   ;;  %v8134_v13 = vld [vmem:[#allocation42_spill] sm:$0xff] }
 0x360   :  { %v5703_v16 = vadd.f32 %v2905_v15, %v8127_v14  ;;  %v2907_v36 = vpop.f32.mrb[83].mxu0 }
 0x361   :  { %v3076_v52 = vmax.f32 %v5701_v61, %v5702_v25  ;;  %v5704_v37 = vadd.f32 %v2907_v36, %v8128_v17  ;;  %v3206_v26 = vmax.f32 %v3176_v19, %v3178_v51  ;;  %v6354_v61 = vld [vmem:[%s8036_s3 + $0x164] ss:$8 sps:$4 sm:$0xff]   ;;  %v8136_v25 = vld [vmem:[#allocation44_spill] sm:$0xff]  ;;  %v8137_v17 = vld [vmem:[#allocation45_spill] sm:$0xff] }
 0x362   :  { %3742 = vmatpush1.bf16.msra.mxu1 %v6337_v50  ;;  %v8135_v50 = vld [vmem:[#allocation43_spill] sm:$0xff] }
 0x363   :  { %v3077_v39 = vmax.f32 %v5703_v16, %v5704_v37  ;;  %3743 = vmatprep.subr.bf16.mxu1 %v6342_v59  ;;  %v7671_v28 = vpack.c.bf16 %v3206_v26, %v3205_v60  ;;  %v3131_v24 = vadd.f32 %v7441_v57, %v3076_v52  ;;  %v6352_v60 = vld [vmem:[%s8036_s3 + $0x160] ss:$8 sps:$4 sm:$0xff]   ;;  %v6357_v16 = vld [vmem:[%s8036_s3 + $0x174] ss:$8 sps:$4 sm:$0xff]  }
 0x365   :  { %v2911_v63 = vpop.f32.mrb[84].mxu0  ;;  %3572 = vmatmul.mubr.bf16.gmra.mrb[100].mxu1 %v7476_v6  ;;  %v3132_v29 = vadd.f32 %v7441_v57, %v3077_v39  ;;  %v3179_v33 = vmax.f32 %v3131_v24, 0.0  ;;  %v8138_v39 = vld [vmem:[#allocation46_spill] sm:$0xff] }
 0x366   :  { %v5705_v54 = vadd.f32 %v2911_v63, %v8129_v55  ;;  %v2913_v8 = vpop.f32.mrb[85].mxu0  ;;  %3581 = vmatprep.mubr.bf16.mxu1 %v8058_v4  ;;  %3744 = vmatpush1.bf16.msra.mxu1 %v6340_v18  ;;  %v6355_v18 = vld [vmem:[%s8036_s3 + $0x170] ss:$8 sps:$4 sm:$0xff]   ;;  %v6360_v55 = vld [vmem:[%s8036_s3 + $0x184] ss:$8 sps:$4 sm:$0xff]  }
 0x367   :  { %v5706_v20 = vadd.f32 %v2913_v8, %v8130_v0  ;;  %v2915_v58 = vpop.f32.mrb[86].mxu0  ;;  %3745 = vmatprep.subr.bf16.mxu1 %v6345_v38  ;;  %v3180_v44 = vmax.f32 %v3132_v29, 0.0 }
 0x368   :  { %v5707_v6 = vadd.f32 %v2915_v58, %v8131_v42  ;;  %v2917_v2 = vpop.f32.mrb[87].mxu0  ;;  %v8140_v58 = vld [vmem:[#allocation48_spill] sm:$0xff] }
 0x369   :  { %v3078_v21 = vmax.f32 %v5705_v54, %v5706_v20  ;;  %v5708_v43 = vadd.f32 %v2917_v2, %v8132_v31  ;;  %v8139_v54 = vld [vmem:[#allocation47_spill] sm:$0xff] }
 0x36a   :  { %3746 = vmatpush1.bf16.msra.mxu1 %v6343_v40 }
 0x36b   :  { %v3133_v32 = vadd.f32 %v7441_v57, %v3078_v21  ;;  %v3079_v22 = vmax.f32 %v5707_v6, %v5708_v43  ;;  %3747 = vmatprep.subr.bf16.mxu1 %v6348_v41 }
 0x36d   :  { %v3181_v12 = vmax.f32 %v3133_v32, 0.0  ;;  %v3134_v46 = vadd.f32 %v7441_v57, %v3079_v22  ;;  %v2921_v23 = vpop.f32.mrb[88].mxu0  ;;  %3582 = vmatmul.mubr.bf16.gmra.mrb[104].mxu1 %v7516_v7 }
 0x36e   :  { %v5709_v62 = vadd.f32 %v2921_v23, %v8133_v47  ;;  %v2923_v1 = vpop.f32.mrb[89].mxu0  ;;  %3591 = vmatprep.mubr.bf16.mxu1 %v8058_v4  ;;  %3748 = vmatpush1.bf16.msra.mxu1 %v6346_v10  ;;  %v6367_v23 = vld [vmem:[%s8036_s3 + $0x1b0] ss:$8 sps:$4 sm:$0xff]   ;;  %v6372_v47 = vld [vmem:[%s8036_s3 + $0x1c4] ss:$8 sps:$4 sm:$0xff]  }
 0x36f   :  { %v3182_v9 = vmax.f32 %v3134_v46, 0.0  ;;  %v5710_v5 = vadd.f32 %v2923_v1, %v8134_v13  ;;  %v2925_v49 = vpop.f32.mrb[90].mxu0  ;;  %3749 = vmatprep.subr.bf16.mxu1 %v6351_v3  ;;  %v3207_v56 = vmax.f32 %v3179_v33, %v3181_v12  ;;  %v6363_v3 = vld [vmem:[%s8036_s3 + $0x194] ss:$8 sps:$4 sm:$0xff]   ;;  %v6361_v33 = vld [vmem:[%s8036_s3 + $0x190] ss:$8 sps:$4 sm:$0xff]  }
 0x370   :  { %v5711_v19 = vadd.f32 %v2925_v49, %v8135_v50  ;;  %v2927_v51 = vpop.f32.mrb[91].mxu0  ;;  %v6366_v12 = vld [vmem:[%s8036_s3 + $0x1a4] ss:$8 sps:$4 sm:$0xff]   ;;  %v6364_v46 = vld [vmem:[%s8036_s3 + $0x1a0] ss:$8 sps:$4 sm:$0xff]  }
 0x371   :  { %v3080_v34 = vmax.f32 %v5709_v62, %v5710_v5  ;;  %v5712_v15 = vadd.f32 %v2927_v51, %v8136_v25  ;;  %v3208_v59 = vmax.f32 %v3180_v44, %v3182_v9  ;;  %v6370_v62 = vld [vmem:[%s8036_s3 + $0x1c0] ss:$8 sps:$4 sm:$0xff]   ;;  %v6375_v1 = vld [vmem:[%s8036_s3 + $0x1d4] ss:$8 sps:$4 sm:$0xff]   ;;  %v6378_v44 = vld [vmem:[%s8036_s3 + $0x1e4] ss:$8 sps:$4 sm:$0xff]  }
 0x372   :  { %3750 = vmatpush1.bf16.msra.mxu1 %v6349_v48  ;;  %v6373_v48 = vld [vmem:[%s8036_s3 + $0x1d0] ss:$8 sps:$4 sm:$0xff]   ;;  %v6376_v9 = vld [vmem:[%s8036_s3 + $0x1e0] ss:$8 sps:$4 sm:$0xff]   ;;  %v6381_v13 = vld [vmem:[%s8036_s3 + $0x1f4] ss:$8 sps:$4 sm:$0xff]  }
 0x373   :  { %v3081_v14 = vmax.f32 %v5711_v19, %v5712_v15  ;;  %3751 = vmatprep.subr.bf16.mxu1 %v6354_v61  ;;  %v7713_v36 = vpack.c.bf16 %v3208_v59, %v3207_v56  ;;  %v3135_v0 = vadd.f32 %v7441_v57, %v3080_v34  ;;  %v6379_v5 = vld [vmem:[%s8036_s3 + $0x1f0] ss:$8 sps:$4 sm:$0xff]   ;;  %v6384_v49 = vld [vmem:[%s8036_s3 + $0x204] ss:$8 sps:$4 sm:$0xff]   ;;  %v6382_v61 = vld [vmem:[%s8036_s3 + $0x200] ss:$8 sps:$4 sm:$0xff]  }
 0x374   :  { %v6387_v56 = vld [vmem:[%s8036_s3 + $0x214] ss:$8 sps:$4 sm:$0xff]   ;;  %v6385_v50 = vld [vmem:[%s8036_s3 + $0x210] ss:$8 sps:$4 sm:$0xff]   ;;  %v6390_v19 = vld [vmem:[%s8036_s3 + $0x224] ss:$8 sps:$4 sm:$0xff]  }
 0x375   :  { %v2931_v52 = vpop.f32.mrb[92].mxu0  ;;  %3592 = vmatmul.mubr.bf16.gmra.mrb[108].mxu1 %v7553_v53  ;;  %v3136_v42 = vadd.f32 %v7441_v57, %v3081_v14  ;;  %v3183_v24 = vmax.f32 %v3135_v0, 0.0  ;;  %v6388_v51 = vld [vmem:[%s8036_s3 + $0x220] ss:$8 sps:$4 sm:$0xff]   ;;  %v6393_v34 = vld [vmem:[%s8036_s3 + $0x234] ss:$8 sps:$4 sm:$0xff]  }
 0x376   :  { %v5713_v37 = vadd.f32 %v2931_v52, %v8137_v17  ;;  %v2933_v26 = vpop.f32.mrb[93].mxu0  ;;  %3601 = vmatprep.mubr.bf16.mxu1 %v8058_v4  ;;  %3752 = vmatpush1.bf16.msra.mxu1 %v6352_v60  ;;  %v6396_v25 = vld [vmem:[%s8036_s3 + $0x244] ss:$8 sps:$4 sm:$0xff]   ;;  %v6394_v15 = vld [vmem:[%s8036_s3 + $0x240] ss:$8 sps:$4 sm:$0xff]  }
 0x377   :  { %v5714_v38 = vadd.f32 %v2933_v26, %v8138_v39  ;;  %v2935_v63 = vpop.f32.mrb[94].mxu0  ;;  %3753 = vmatprep.subr.bf16.mxu1 %v6357_v16  ;;  %v3184_v43 = vmax.f32 %v3136_v42, 0.0  ;;  %v6399_v59 = vld [vmem:[%s8036_s3 + $0x254] ss:$8 sps:$4 sm:$0xff]   ;;  %v6397_v60 = vld [vmem:[%s8036_s3 + $0x250] ss:$8 sps:$4 sm:$0xff]  }
 0x378   :  { %v5715_v8 = vadd.f32 %v2935_v63, %v8139_v54  ;;  %v2937_v40 = vpop.f32.mrb[95].mxu0  ;;  %v6402_v14 = vld [vmem:[%s8036_s3 + $0x264] ss:$8 sps:$4 sm:$0xff]   ;;  %v6400_v16 = vld [vmem:[%s8036_s3 + $0x260] ss:$8 sps:$4 sm:$0xff]   ;;  %v6411_v63 = vld [vmem:[%s8038_s5 + $0x10] sm:$0xff]  }
 0x379   :  { %v3082_v20 = vmax.f32 %v5713_v37, %v5714_v38  ;;  %v5716_v41 = vadd.f32 %v2937_v40, %v8140_v58  ;;  %v6405_v52 = vld [vmem:[%s8036_s3 + $0x274] ss:$8 sps:$4 sm:$0xff]   ;;  %v6403_v17 = vld [vmem:[%s8036_s3 + $0x270] ss:$8 sps:$4 sm:$0xff]   ;;  %v6406_v37 = vld [vmem:[%s8038_s5 + $0x40] sm:$0xff]  }
 0x37a   :  { %3754 = vmatpush1.bf16.msra.mxu1 %v6355_v18  ;;  %v6407_v26 = vld [vmem:[%s8038_s5] sm:$0xff]   ;;  %v6408_v18 = vld [vmem:[%s8038_s5 + $0x48] sm:$0xff]   ;;  %v6410_v38 = vld [vmem:[%s8038_s5 + $0x50] sm:$0xff]  }
 0x37b   :  { %v3137_v6 = vadd.f32 %v7441_v57, %v3082_v20  ;;  %v3083_v2 = vmax.f32 %v5715_v8, %v5716_v41  ;;  %3981 = vmatprep.subr.bf16.mxu1 %v6360_v55  ;;  %v6409_v39 = vld [vmem:[%s8038_s5 + $0x8] sm:$0xff]   ;;  %v6420_v55 = vld [vmem:[%s8038_s5 + $0x78] sm:$0xff]   ;;  %v6422_v8 = vld [vmem:[%s8038_s5 + $0xc0] sm:$0xff]  }
 0x37c   :  { %v6421_v54 = vld [vmem:[%s8038_s5 + $0x38] sm:$0xff]  }
 0x37d   :  { %v3185_v21 = vmax.f32 %v3137_v6, 0.0  ;;  %v3138_v31 = vadd.f32 %v7441_v57, %v3083_v2  ;;  %3602 = vmatmul.mubr.bf16.gmra.mrb[112].mxu1 %v7569_v11  ;;  %v6358_v57 = vld [vmem:[%s8036_s3 + $0x180] ss:$8 sps:$4 sm:$0xff]  }
 0x37e   :  { %3611 = vmatprep.mubr.bf16.mxu1 %v8058_v4  ;;  %v7941_v6 = vld [vmem:[%s8039_s4] ss:$0 sm:$0xff] }
 0x37f   :  { %v3186_v10 = vmax.f32 %v3138_v31, 0.0  ;;  %v7733_v29 = vmax.f32 %v3183_v24, %v3185_v21 }
 0x381   :  { %v7735_v32 = vmax.f32 %v3184_v43, %v3186_v10 }
 0x383   :  { %v3222_v22 = vpack.c.bf16 %v7735_v32, %v7733_v29 }
 0x385   :  { %3612 = vmatmul.mubr.bf16.gmra.mrb[116].mxu1 %v7585_v27 }
 0x386   :  { %3621 = vmatprep.mubr.bf16.mxu1 %v8058_v4 }
 0x38d   :  { %3622 = vmatmul.mubr.bf16.gmra.mrb[120].mxu1 %v7601_v35 }
 0x38e   :  { %3631 = vmatprep.mubr.bf16.mxu1 %v8058_v4 }
 0x395   :  { %3632 = vmatmul.mubr.bf16.gmra.mrb[124].mxu1 %v7617_v45 }
 0x396   :  { %3771 = vmatprep.mubr.bf16.mxu1 %v8058_v4 }
 0x39d   :  { %3772 = vmatmul.mubr.bf16.vlgmr.msra.gmra.mrb[96].mxu1 %v7516_v7  ;;  %v6369_v7 = vld [vmem:[%s8036_s3 + $0x1b4] ss:$8 sps:$4 sm:$0xff]  }
 0x39e   :  { %3982 = vmatpush1.bf16.msra.mxu1 %v6358_v57  ;;  %3781 = vmatprep.mubr.bf16.mxu1 %v8058_v4 }
 0x39f   :  { %3983 = vmatprep.subr.bf16.mxu1 %v6363_v3 }
 0x3a2   :  { %3984 = vmatpush1.bf16.msra.mxu1 %v6361_v33 }
 0x3a3   :  { %3985 = vmatprep.subr.bf16.mxu1 %v6366_v12 }
 0x3a5   :  { %3782 = vmatmul.mubr.bf16.gmra.mrb[100].mxu1 %v7553_v53 }
 0x3a6   :  { %3791 = vmatprep.mubr.bf16.mxu1 %v8058_v4  ;;  %3986 = vmatpush1.bf16.msra.mxu1 %v6364_v46 }
 0x3a7   :  { %3987 = vmatprep.subr.bf16.mxu1 %v6369_v7 }
 0x3aa   :  { %3988 = vmatpush1.bf16.msra.mxu1 %v6367_v23 }
 0x3ab   :  { %3989 = vmatprep.subr.bf16.mxu1 %v6372_v47 }
 0x3ad   :  { %3792 = vmatmul.mubr.bf16.gmra.mrb[104].mxu1 %v7569_v11 }
 0x3ae   :  { %3801 = vmatprep.mubr.bf16.mxu1 %v8058_v4  ;;  %3990 = vmatpush1.bf16.msra.mxu1 %v6370_v62 }
 0x3af   :  { %3991 = vmatprep.subr.bf16.mxu1 %v6375_v1 }
 0x3b2   :  { %3992 = vmatpush1.bf16.msra.mxu1 %v6373_v48 }
 0x3b3   :  { %3993 = vmatprep.subr.bf16.mxu1 %v6378_v44 }
 0x3b5   :  { %3802 = vmatmul.mubr.bf16.gmra.mrb[108].mxu1 %v7585_v27 }
 0x3b6   :  { %3811 = vmatprep.mubr.bf16.mxu1 %v8058_v4  ;;  %3994 = vmatpush1.bf16.msra.mxu1 %v6376_v9 }
 0x3b7   :  { %3995 = vmatprep.subr.bf16.mxu1 %v6381_v13 }
 0x3ba   :  { %3996 = vmatpush1.bf16.msra.mxu1 %v6379_v5 }
 0x3bb   :  { %4223 = vmatprep.subr.bf16.mxu1 %v6384_v49 }
 0x3bd   :  { %3812 = vmatmul.mubr.bf16.gmra.mrb[112].mxu1 %v7601_v35 }
 0x3be   :  { %3821 = vmatprep.mubr.bf16.mxu1 %v8058_v4 }
 0x3c5   :  { %3822 = vmatmul.mubr.bf16.gmra.mrb[116].mxu1 %v7617_v45 }
 0x3c6   :  { %3831 = vmatprep.mubr.bf16.mxu1 %v8058_v4 }
 0x3cd   :  { %3832 = vmatmul.mubr.bf16.gmra.mrb[120].mxu1 %v7633_v30 }
 0x3ce   :  { %3841 = vmatprep.mubr.bf16.mxu1 %v8058_v4 }
 0x3d5   :  { %3842 = vmatmul.mubr.bf16.gmra.mrb[124].mxu1 %v7671_v28 }
 0x3d6   :  { %4013 = vmatprep.mubr.bf16.mxu1 %v8058_v4 }
 0x3dd   :  { %4014 = vmatmul.mubr.bf16.vlgmr.msra.gmra.mrb[96].mxu1 %v7553_v53  ;;  %v6391_v53 = vld [vmem:[%s8036_s3 + $0x230] ss:$8 sps:$4 sm:$0xff]  }
 0x3de   :  { %4224 = vmatpush1.bf16.msra.mxu1 %v6382_v61  ;;  %4023 = vmatprep.mubr.bf16.mxu1 %v8058_v4 }
 0x3df   :  { %4225 = vmatprep.subr.bf16.mxu1 %v6387_v56 }
 0x3e2   :  { %4226 = vmatpush1.bf16.msra.mxu1 %v6385_v50 }
 0x3e3   :  { %4227 = vmatprep.subr.bf16.mxu1 %v6390_v19 }
 0x3e5   :  { %4024 = vmatmul.mubr.bf16.gmra.mrb[100].mxu1 %v7569_v11 }
 0x3e6   :  { %4033 = vmatprep.mubr.bf16.mxu1 %v8058_v4  ;;  %4228 = vmatpush1.bf16.msra.mxu1 %v6388_v51 }
 0x3e7   :  { %4229 = vmatprep.subr.bf16.mxu1 %v6393_v34 }
 0x3ea   :  { %4230 = vmatpush1.bf16.msra.mxu1 %v6391_v53 }
 0x3eb   :  { %4231 = vmatprep.subr.bf16.mxu1 %v6396_v25 }
 0x3ed   :  { %4034 = vmatmul.mubr.bf16.gmra.mrb[104].mxu1 %v7585_v27 }
 0x3ee   :  { %4043 = vmatprep.mubr.bf16.mxu1 %v8058_v4  ;;  %4232 = vmatpush1.bf16.msra.mxu1 %v6394_v15 }
 0x3ef   :  { %4233 = vmatprep.subr.bf16.mxu1 %v6399_v59 }
 0x3f2   :  { %4234 = vmatpush1.bf16.msra.mxu1 %v6397_v60 }
 0x3f3   :  { %4235 = vmatprep.subr.bf16.mxu1 %v6402_v14 }
 0x3f5   :  { %4044 = vmatmul.mubr.bf16.gmra.mrb[108].mxu1 %v7601_v35 }
 0x3f6   :  { %4053 = vmatprep.mubr.bf16.mxu1 %v8058_v4  ;;  %4236 = vmatpush1.bf16.msra.mxu1 %v6400_v16 }
 0x3f7   :  { %4237 = vmatprep.subr.bf16.mxu1 %v6405_v52 }
 0x3fa   :  { %4238 = vmatpush1.bf16.msra.mxu1 %v6403_v17 }
 0x3fb   :  { %5556 = vmatprep.subr.bf16.mxu1 %v6406_v37 }
 0x3fd   :  { %4054 = vmatmul.mubr.bf16.gmra.mrb[112].mxu1 %v7617_v45 }
 0x3fe   :  { %4063 = vmatprep.mubr.bf16.mxu1 %v8058_v4 }
 0x405   :  { %4064 = vmatmul.mubr.bf16.gmra.mrb[116].mxu1 %v7633_v30 }
 0x406   :  { %4073 = vmatprep.mubr.bf16.mxu1 %v8058_v4 }
 0x40d   :  { %4074 = vmatmul.mubr.bf16.gmra.mrb[120].mxu1 %v7671_v28 }
 0x40e   :  { %4083 = vmatprep.mubr.bf16.mxu1 %v8058_v4 }
 0x415   :  { %4084 = vmatmul.mubr.bf16.gmra.mrb[124].mxu1 %v7713_v36 }
 0x416   :  { %4255 = vmatprep.mubr.bf16.mxu1 %v8058_v4 }
 0x41d   :  { %4256 = vmatmul.mubr.bf16.vlgmr.msra.gmra.mrb[96].mxu1 %v7569_v11  ;;  %v6412_v11 = vld [vmem:[%s8038_s5 + $0x58] sm:$0xff]  }
 0x41e   :  { %4265 = vmatprep.mubr.bf16.mxu1 %v8058_v4  ;;  %5557 = vmatpush3.bf16.msra.mxu1 %v6407_v26 }
 0x41f   :  { %5558 = vmatprep.subr.bf16.mxu1 %v6408_v18 }
 0x422   :  { %5559 = vmatpush3.bf16.msra.mxu1 %v6409_v39 }
 0x423   :  { %5560 = vmatprep.subr.bf16.mxu1 %v6410_v38 }
 0x425   :  { %4266 = vmatmul.mubr.bf16.gmra.mrb[100].mxu1 %v7585_v27  ;;  %v6413_v27 = vld [vmem:[%s8038_s5 + $0x18] sm:$0xff]  }
 0x426   :  { %4275 = vmatprep.mubr.bf16.mxu1 %v8058_v4  ;;  %5561 = vmatpush3.bf16.msra.mxu1 %v6411_v63 }
 0x427   :  { %5562 = vmatprep.subr.bf16.mxu1 %v6412_v11  ;;  %v6423_v11 = vld [vmem:[%s8038_s5 + $0x80] sm:$0xff]  }
 0x42a   :  { %5563 = vmatpush3.bf16.msra.mxu1 %v6413_v27  ;;  %v6424_v27 = vld [vmem:[%s8038_s5 + $0xc8] sm:$0xff]  }
 0x42d   :  { %4276 = vmatmul.mubr.bf16.gmra.mrb[104].mxu1 %v7601_v35  ;;  %v6414_v35 = vld [vmem:[%s8038_s5 + $0x60] sm:$0xff]  }
 0x42e   :  { %4285 = vmatprep.mubr.bf16.mxu1 %v8058_v4  ;;  %5564 = vmatprep.subr.bf16.mxu1 %v6414_v35 }
 0x435   :  { %4286 = vmatmul.mubr.bf16.gmra.mrb[108].mxu1 %v7617_v45  ;;  %v6416_v45 = vld [vmem:[%s8038_s5 + $0x68] sm:$0xff]  }
 0x436   :  { %4295 = vmatprep.mubr.bf16.mxu1 %v8058_v4 }
 0x43d   :  { %4296 = vmatmul.mubr.bf16.gmra.mrb[112].mxu1 %v7633_v30  ;;  %v6417_v30 = vld [vmem:[%s8038_s5 + $0x28] sm:$0xff]  }
 0x43e   :  { %4305 = vmatprep.mubr.bf16.mxu1 %v8058_v4 }
 0x445   :  { %4306 = vmatmul.mubr.bf16.gmra.mrb[116].mxu1 %v7671_v28  ;;  %v6418_v28 = vld [vmem:[%s8038_s5 + $0x70] sm:$0xff]  }
 0x446   :  { %4315 = vmatprep.mubr.bf16.mxu1 %v8058_v4 }
 0x44d   :  { %4316 = vmatmul.mubr.bf16.gmra.mrb[120].mxu1 %v7713_v36  ;;  %v6419_v36 = vld [vmem:[%s8038_s5 + $0x30] sm:$0xff]  }
 0x44e   :  { %4325 = vmatprep.mubr.bf16.mxu1 %v8058_v4  ;;  %v6415_v4 = vld [vmem:[%s8038_s5 + $0x20] sm:$0xff]  }
 0x44f   :  { %5565 = vmatpush3.bf16.msra.mxu1 %v6415_v4  ;;  %v6425_v4 = vld [vmem:[%s8038_s5 + $0x88] sm:$0xff]  }
 0x450   :  { %5566 = vmatprep.subr.bf16.mxu1 %v6416_v45 }
 0x453   :  { %5567 = vmatpush3.bf16.msra.mxu1 %v6417_v30  ;;  %v6426_v30 = vld [vmem:[%s8038_s5 + $0xd0] sm:$0xff]  }
 0x454   :  { %5568 = vmatprep.subr.bf16.mxu1 %v6418_v28 }
 0x455   :  { %4326 = vmatmul.mubr.bf16.gmra.mrb[124].mxu1 %v3222_v22 }
 0x457   :  { %5569 = vmatpush3.bf16.msra.mxu1 %v6419_v36 }
 0x458   :  { %5570 = vmatprep.subr.bf16.mxu1 %v6420_v55 }
 0x45b   :  { %5571 = vmatpush3.bf16.msra.mxu1 %v6421_v54 }
 0x45c   :  { %5578 = vmatprep.subr.bf16.mxu1 %v6422_v8 }
 0x4f0   :  { %v4257_v40 = vpop.f32.mrb[96].mxu1 }
 0x4f1   :  { %v4259_v0 = vpop.f32.mrb[97].mxu1 }
 0x4f2   :  { %v4368_v20 = vmax.f32 %v4257_v40, %v4259_v0  ;;  %v4261_v58 = vpop.f32.mrb[98].mxu1 }
 0x4f3   :  { %v4263_v41 = vpop.f32.mrb[99].mxu1 }
 0x4f4   :  { %v4369_v42 = vmax.f32 %v4261_v58, %v4263_v41  ;;  %v4391_v21 = vadd.f32 %v7941_v6, %v4368_v20  ;;  %v6427_v20 = vld [vmem:[%s8038_s5 + $0x90] sm:$0xff]   ;;  %v6428_v58 = vld [vmem:[%s8038_s5 + $0xd8] sm:$0xff]  }
 0x4f6   :  { %v4392_v29 = vadd.f32 %v7941_v6, %v4369_v42  ;;  %v4407_v57 = vmax.f32 %v4391_v21, 0.0 }
 0x4f8   :  { %v4267_v2 = vpop.f32.mrb[100].mxu1  ;;  %v4408_v12 = vmax.f32 %v4392_v29, 0.0 }
 0x4f9   :  { %v4269_v24 = vpop.f32.mrb[101].mxu1 }
 0x4fa   :  { %v4370_v31 = vmax.f32 %v4267_v2, %v4269_v24  ;;  %v4271_v43 = vpop.f32.mrb[102].mxu1 }
 0x4fb   :  { %v4273_v10 = vpop.f32.mrb[103].mxu1 }
 0x4fc   :  { %v4393_v32 = vadd.f32 %v7941_v6, %v4370_v31  ;;  %v4371_v22 = vmax.f32 %v4271_v43, %v4273_v10  ;;  %v6429_v10 = vld [vmem:[%s8038_s5 + $0x98] sm:$0xff]  }
 0x4fe   :  { %v4409_v3 = vmax.f32 %v4393_v32, 0.0  ;;  %v4394_v33 = vadd.f32 %v7941_v6, %v4371_v22  ;;  %v6430_v32 = vld [vmem:[%s8038_s5 + $0xe0] sm:$0xff]  }
 0x500   :  { %v4423_v46 = vmax.f32 %v4407_v57, %v4409_v3  ;;  %v4410_v7 = vmax.f32 %v4394_v33, 0.0  ;;  %v4277_v23 = vpop.f32.mrb[104].mxu1 }
 0x501   :  { %v4279_v47 = vpop.f32.mrb[105].mxu1 }
 0x502   :  { %v4424_v62 = vmax.f32 %v4408_v12, %v4410_v7  ;;  %v4372_v1 = vmax.f32 %v4277_v23, %v4279_v47  ;;  %v4281_v48 = vpop.f32.mrb[106].mxu1  ;;  %v6431_v7 = vld [vmem:[%s8038_s5 + $0xa0] sm:$0xff]   ;;  %v6432_v23 = vld [vmem:[%s8038_s5 + $0xe8] sm:$0xff]  }
 0x503   :  { %v4283_v44 = vpop.f32.mrb[107].mxu1 }
 0x504   :  { %v4431_v9 = vpack.c.bf16 %v4424_v62, %v4423_v46  ;;  %v4373_v13 = vmax.f32 %v4281_v48, %v4283_v44  ;;  %v4395_v61 = vadd.f32 %v7941_v6, %v4372_v1  ;;  %v6433_v62 = vld [vmem:[%s8038_s5 + $0xa8] sm:$0xff]   ;;  %v6434_v48 = vld [vmem:[%s8038_s5 + $0xf0] sm:$0xff]  }
 0x506   :  { %v4396_v51 = vadd.f32 %v7941_v6, %v4373_v13  ;;  %v4411_v25 = vmax.f32 %v4395_v61, 0.0 }
 0x508   :  { %v4287_v5 = vpop.f32.mrb[108].mxu1  ;;  %v4412_v60 = vmax.f32 %v4396_v51, 0.0 }
 0x509   :  { %v4289_v49 = vpop.f32.mrb[109].mxu1 }
 0x50a   :  { %v4374_v56 = vmax.f32 %v4287_v5, %v4289_v49  ;;  %v4291_v50 = vpop.f32.mrb[110].mxu1 }
 0x50b   :  { %v4293_v19 = vpop.f32.mrb[111].mxu1 }
 0x50c   :  { %v4397_v34 = vadd.f32 %v7941_v6, %v4374_v56  ;;  %v4375_v53 = vmax.f32 %v4291_v50, %v4293_v19  ;;  %v6435_v50 = vld [vmem:[%s8038_s5 + $0xb0] sm:$0xff]   ;;  %v6436_v19 = vld [vmem:[%s8038_s5 + $0xf8] sm:$0xff]  }
 0x50e   :  { %v4413_v15 = vmax.f32 %v4397_v34, 0.0  ;;  %v4398_v59 = vadd.f32 %v7941_v6, %v4375_v53 }
 0x510   :  { %v4425_v14 = vmax.f32 %v4411_v25, %v4413_v15  ;;  %v4414_v16 = vmax.f32 %v4398_v59, 0.0  ;;  %v4297_v52 = vpop.f32.mrb[112].mxu1 }
 0x511   :  { %v4299_v17 = vpop.f32.mrb[113].mxu1 }
 0x512   :  { %v4426_v37 = vmax.f32 %v4412_v60, %v4414_v16  ;;  %v4376_v26 = vmax.f32 %v4297_v52, %v4299_v17  ;;  %v4301_v18 = vpop.f32.mrb[114].mxu1  ;;  %v6437_v60 = vld [vmem:[%s8038_s5 + $0xb8] sm:$0xff]   ;;  %v6451_v52 = vmov 0.0   ;;  %v6439_v17 = vld [vmem:[%s8040_s7 + $0x8] sm:$0xff]  }
 0x513   :  { %v4303_v39 = vpop.f32.mrb[115].mxu1 }
 0x514   :  { %v4377_v38 = vmax.f32 %v4301_v18, %v4303_v39  ;;  %v4432_v63 = vpack.c.bf16 %v4426_v37, %v4425_v14  ;;  %v4399_v28 = vadd.f32 %v7941_v6, %v4376_v26  ;;  %v6440_v37 = vld [vmem:[%s8040_s7 + $0x10] sm:$0xff]   ;;  %v6441_v26 = vld [vmem:[%s8040_s7 + $0x18] ss:$0 sps:$4 sm:$0x11]  }
 0x515   :  { %v4824_v18 = vsel %vm4822_vm2, %v6441_v26, 0 }
 0x516   :  { %4730 = vmatprep.mubr.bf16.mxu1 %v4432_v63  ;;  %v4400_v8 = vadd.f32 %v7941_v6, %v4377_v38  ;;  %v4415_v41 = vmax.f32 %v4399_v28, 0.0 }
 0x517   :  { %4731 = vmatmul.mubr.bf16.vlgmr.msra.gmra.mrb[128].mxu1 %v4431_v9 }
 0x518   :  { %v4307_v35 = vpop.f32.mrb[116].mxu1  ;;  %5579 = vmatpush3.bf16.msra.mxu1 %v6423_v11  ;;  %v4416_v24 = vmax.f32 %v4400_v8, 0.0 }
 0x519   :  { %v4309_v45 = vpop.f32.mrb[117].mxu1  ;;  %5580 = vmatprep.subr.bf16.mxu1 %v6424_v27 }
 0x51a   :  { %v4378_v36 = vmax.f32 %v4307_v35, %v4309_v45  ;;  %v4311_v55 = vpop.f32.mrb[118].mxu1 }
 0x51b   :  { %v4313_v54 = vpop.f32.mrb[119].mxu1 }
 0x51c   :  { %v4401_v40 = vadd.f32 %v7941_v6, %v4378_v36  ;;  %v4379_v0 = vmax.f32 %v4311_v55, %v4313_v54  ;;  %5581 = vmatpush3.bf16.msra.mxu1 %v6425_v4  ;;  %v5517_v4 = vld [vmem:[%s8041_s6] ss:$0 sm:$0xff] }
 0x51d   :  { %5582 = vmatprep.subr.bf16.mxu1 %v6426_v30 }
 0x51e   :  { %v4417_v42 = vmax.f32 %v4401_v40, 0.0  ;;  %v4402_v2 = vadd.f32 %v7941_v6, %v4379_v0 }
 0x520   :  { %v4427_v21 = vmax.f32 %v4415_v41, %v4417_v42  ;;  %v4418_v31 = vmax.f32 %v4402_v2, 0.0  ;;  %v4317_v43 = vpop.f32.mrb[120].mxu1  ;;  %5583 = vmatpush3.bf16.msra.mxu1 %v6427_v20  ;;  %v5550_v2 = vld [vmem:[%s8042_s8] ss:$0 sm:$0xff] }
 0x521   :  { %v4319_v29 = vpop.f32.mrb[121].mxu1  ;;  %5584 = vmatprep.subr.bf16.mxu1 %v6428_v58 }
 0x522   :  { %v4428_v22 = vmax.f32 %v4416_v24, %v4418_v31  ;;  %v4380_v57 = vmax.f32 %v4317_v43, %v4319_v29  ;;  %v4321_v3 = vpop.f32.mrb[122].mxu1 }
 0x523   :  { %v4323_v33 = vpop.f32.mrb[123].mxu1 }
 0x524   :  { %v4433_v12 = vpack.c.bf16 %v4428_v22, %v4427_v21  ;;  %v4381_v46 = vmax.f32 %v4321_v3, %v4323_v33  ;;  %5585 = vmatpush3.bf16.msra.mxu1 %v6429_v10  ;;  %v4403_v44 = vadd.f32 %v7941_v6, %v4380_v57 }
 0x525   :  { %5586 = vmatprep.subr.bf16.mxu1 %v6430_v32 }
 0x526   :  { %v4404_v49 = vadd.f32 %v7941_v6, %v4381_v46  ;;  %v4419_v51 = vmax.f32 %v4403_v44, 0.0 }
 0x528   :  { %v4327_v47 = vpop.f32.mrb[124].mxu1  ;;  %5587 = vmatpush3.bf16.msra.mxu1 %v6431_v7  ;;  %v4420_v25 = vmax.f32 %v4404_v49, 0.0 }
 0x529   :  { %v4329_v1 = vpop.f32.mrb[125].mxu1  ;;  %5588 = vmatprep.subr.bf16.mxu1 %v6432_v23 }
 0x52a   :  { %v4382_v9 = vmax.f32 %v4327_v47, %v4329_v1  ;;  %v4331_v13 = vpop.f32.mrb[126].mxu1 }
 0x52b   :  { %v4333_v5 = vpop.f32.mrb[127].mxu1 }
 0x52c   :  { %v4405_v61 = vadd.f32 %v7941_v6, %v4382_v9  ;;  %v4383_v56 = vmax.f32 %v4331_v13, %v4333_v5  ;;  %5589 = vmatpush3.bf16.msra.mxu1 %v6433_v62 }
 0x52d   :  { %5590 = vmatprep.subr.bf16.mxu1 %v6434_v48 }
 0x52e   :  { %v4421_v34 = vmax.f32 %v4405_v61, 0.0  ;;  %v4406_v53 = vadd.f32 %v7941_v6, %v4383_v56  ;;  %v6438_v6 = vld [vmem:[%s8040_s7] sm:$0xff]  }
 0x530   :  { %v4429_v15 = vmax.f32 %v4419_v51, %v4421_v34  ;;  %v4422_v59 = vmax.f32 %v4406_v53, 0.0  ;;  %5591 = vmatpush3.bf16.msra.mxu1 %v6435_v50 }
 0x531   :  { %5592 = vmatprep.subr.bf16.mxu1 %v6436_v19 }
 0x532   :  { %v4430_v14 = vmax.f32 %v4420_v25, %v4422_v59 }
 0x534   :  { %5593 = vmatpush3.bf16.msra.mxu1 %v6437_v60  ;;  %v4434_v16 = vpack.c.bf16 %v4430_v14, %v4429_v15 }
 0x535   :  { %5605 = vmatprep.subr.bf16.mxu1 %v6451_v52 }
 0x536   :  { %4771 = vmatprep.mubr.bf16.mxu1 %v4434_v16 }
 0x537   :  { %4772 = vmatmul.mubr.bf16.vlgmr.msra.gmra.mrb[132].mxu1 %v4433_v12 }
 0x538   :  { %5606 = vmatpush3.bf16.msra.mxu1 %v6438_v6  ;;  %5613 = vmatprep.mubr.msk.bf16.mxu1 %vm6452_vm3, %v6451_v52 }
 0x539   :  { %5607 = vmatprep.subr.bf16.mxu1 %v6451_v52 }
 0x53c   :  { %5608 = vmatpush3.bf16.msra.mxu1 %v6439_v17 }
 0x53d   :  { %5609 = vmatprep.subr.bf16.mxu1 %v6451_v52 }
 0x540   :  { %5610 = vmatpush3.bf16.msra.mxu1 %v6440_v37 }
 0x541   :  { %5611 = vmatprep.subr.bf16.mxu1 %v6451_v52 }
 0x544   :  { %5612 = vmatpush3.bf16.msra.mxu1 %v4824_v18 }
 0x5ea   :  { %v5572_v39 = vpop.f32.mrb[128].mxu1 }
 0x5eb   :  { %v5573_v38 = vpop.f32.mrb[129].mxu1 }
 0x5ec   :  { %v5574_v63 = vadd.f32 %v5573_v38, %v5572_v39  ;;  %v5575_v11 = vpop.f32.mrb[130].mxu1 }
 0x5ed   :  { %v5576_v27 = vpop.f32.mrb[131].mxu1 }
 0x5ee   :  { %v5577_v35 = vadd.f32 %v5576_v27, %v5575_v11  ;;  %v4733_v28 = vadd.f32 %v5574_v63, %v5517_v4 }
 0x5f0   :  { %v4736_v8 = vadd.f32 %v5577_v35, %v5517_v4 }
 0x60a   :  { %v5594_v45 = vpop.f32.mrb[132].mxu1 }
 0x60b   :  { %v5595_v30 = vpop.f32.mrb[133].mxu1 }
 0x60c   :  { %v5596_v36 = vadd.f32 %v5595_v30, %v5594_v45  ;;  %v5597_v55 = vpop.f32.mrb[134].mxu1 }
 0x60d   :  { %v5598_v54 = vpop.f32.mrb[135].mxu1 }
 0x60e   :  { %v4774_v40 = vadd.f32 %v5596_v36, %v4733_v28  ;;  %v5599_v0 = vadd.f32 %v5598_v54, %v5597_v55 }
 0x610   :  { %v4777_v20 = vadd.f32 %v5599_v0, %v4736_v8  ;;  %v4780_v58 = vmax.f32 %v4774_v40, 0.0 }
 0x612   :  { %v4781_v41 = vmax.f32 %v4777_v20, 0.0 }
 0x614   :  { %v4782_v42 = vpack.c.bf16 %v4781_v41, %v4780_v58 }
 0x616   :  { %5614 = vmatmul.mubr.msk.bf16.vlgmr.msra.gmra.mrb[136].mxu1 %vm4818_vm4, %v4782_v42 }
 0x6e9   :  { %v4860_v24 = vpop.f32.mrb[136].mxu1 }
 0x6ea   :  { %v4861_v21 = vadd.f32 %v5550_v2, %v4860_v24  ;;  %v5615_v31 = vpop.f32.mrb[137].mxu1 }
 0x6eb   :  { %v4863_v43 = vpop.f32.mrb[138].mxu1 }
 0x6ec   :  { %v4864_v10 = vadd.f32 %v5550_v2, %v4863_v43  ;;  %v5616_v29 = vpop.f32.mrb[139].mxu1  ;;  %v4868_v32 = vsel %vm4867_vm5, %v4861_v21, -inf }
 0x6ed   :  { %4869 = vmax.xlane.f32.xlu0 %v4868_v32 }
 0x6ee   :  { %v4871_v22 = vsel %vm4867_vm5, %v4864_v10, -inf }
 0x6f1   :  { %4872 = vmax.xlane.f32.xlu0 %v4871_v22 }
 0x77a   :  { %v4870_v57 = vpop.xlane.xlu0 %4869 }
 0x77b   :  { %v4874_v3 = vsub.f32 %v4861_v21, %v4870_v57 }
 0x77d   :  { %v4876_v33 = vmul.f32 1.442695, %v4874_v3 }
 0x77e   :  { %v4873_v12 = vpop.xlane.xlu0 %4872 }
 0x77f   :  { %6442 = vpow2.f32 %v4876_v33  ;;  %v4875_v46 = vsub.f32 %v4864_v10, %v4873_v12 }
 0x781   :  { %v4878_v7 = vmul.f32 1.442695, %v4875_v46 }
 0x783   :  { %6444 = vpow2.f32 %v4878_v7 }
 0x789   :  { %v6443_v23 = vpop.eup %6442 }
 0x78a   :  { %v4880_v47 = vsel %vm4867_vm5, %v6443_v23, 0.0 }
 0x78b   :  { %4881 = vadd.xlane.f32.xlu1 %v4880_v47 }
 0x78d   :  { %v6445_v62 = vpop.eup %6444 }
 0x78e   :  { %v4883_v1 = vsel %vm4867_vm5, %v6445_v62, 0.0 }
 0x78f   :  { %4884 = vadd.xlane.f32.xlu1 %v4883_v1 }
 0x818   :  { %v4882_v48 = vpop.xlane.xlu1 %4881 }
 0x819   :  { %6446 = vlog2.f32 %v4882_v48 }
 0x81c   :  { %v4885_v44 = vpop.xlane.xlu1 %4884 }
 0x81d   :  { %6448 = vlog2.f32 %v4885_v44 }
 0x823   :  { %v6447_v9 = vpop.eup %6446 }
 0x824   :  { %v4887_v13 = vmul.f32 0.6931472, %v6447_v9 }
 0x826   :  { %v4890_v5 = vsub.f32 %v4874_v3, %v4887_v13 }
 0x827   :  { %v6449_v49 = vpop.eup %6448 }
 0x828   :  { %4892 = vst.msk [vmem:[%s8043_s9] sm:$0xff] %vm4867_vm5, %v4890_v5  ;;  %v4889_v61 = vmul.f32 0.6931472, %v6449_v49 }
 0x82a   :  { %v4891_v56 = vsub.f32 %v4875_v46, %v4889_v61 }
 0x82c   :  { %4893 = vst.msk [vmem:[%s8043_s9 + $0x8] sm:$0xff] %vm4867_vm5, %v4891_v56 }

</bundles_post_ra>
